<compile_context>
chip_gen: v7x
topology: tpu7x:2x2x1
jax: 0.10.0
libtpu: 0.0.40
codegen_flags: <defaults>
</compile_context>

<pallas_src>
import functools

import jax
import jax.numpy as jnp
from jax import lax
from jax.experimental import pallas as pl
from jax.experimental.pallas import tpu as pltpu


_SQRT_2_OVER_PI = 0.7978845608028654
_LANE = 128      # lane width: channel dims padded to a multiple of this
_SUB = 8         # sublane width: scratch row pitch / interior offset aligned to this
_PADW = 8        # sublane-aligned column offset of the conv interior inside the scratch


def _round_up(n, m):
    return ((n + m - 1) // m) * m


def _gelu(x):
    # tanh-approximate GELU (used identically in kernel and reference), f32 on the VPU/EUP.
    return 0.5 * x * (1.0 + jnp.tanh(_SQRT_2_OVER_PI * (x + 0.044715 * x * x * x)))


def _layernorm_padded(x, g, b, c_valid, c_total, eps=1e-5):
    """LayerNorm over the last dim where lanes [c_valid:c_total] are zero padding.

    mean uses sum/ c_valid (padded lanes contribute 0); variance subtracts the exact
    (c_total - c_valid) * mu^2 contribution of the padded lanes. g/b are zero in padded lanes,
    so the output stays zero there.
    """
    inv_c = 1.0 / float(c_valid)
    mu = jnp.sum(x, axis=-1, keepdims=True) * inv_c
    d = x - mu
    s2 = jnp.sum(d * d, axis=-1, keepdims=True)
    var = (s2 - float(c_total - c_valid) * mu * mu) * inv_c
    return d * lax.rsqrt(var + eps) * g + b


def focalnet_block_kernel(H, W, C,
                          x_ref,
                          ln1_g_ref, ln1_b_ref,
                          wqctx_ref, bqctx_ref,
                          wg_ref, bg_ref,
                          wdw_ref,
                          wh_ref, bh_ref,
                          wp_ref, bp_ref,
                          ln2_g_ref, ln2_b_ref,
                          w1_ref, b1_ref,
                          w2_ref, b2_ref,
                          out_ref,
                          pad_ref):
    # x_ref    : (1, L, Cp)  one batch element, L = H*W, Cp = C rounded up to 128 lanes
    # wqctx_ref: (Cp, 2*Cp)  bf16, [Wq | Wctx]
    # wdw_ref  : (9, Cp)     f32 depthwise 3x3 weights, row k = kh*3 + kw
    # pad_ref  : (H+2, PITCH, Cp) f32 scratch for the zero-padded conv input
    L, Cp = x_ref.shape[1], x_ref.shape[2]
    x = x_ref[0]                                           # (L, Cp) f32, VMEM-resident

    # ---------------- pre-norm (norm1) ----------------
    xn = _layernorm_padded(x, ln1_g_ref[...], ln1_b_ref[...], C, Cp)   # (L, Cp)

    # ------------- focal modulation: fused q|ctx projection (MXU, bf16 in / f32 acc) -------------
    xn_b = xn.astype(jnp.bfloat16)
    qctx = jnp.dot(xn_b, wqctx_ref[...],
                   preferred_element_type=jnp.float32) + bqctx_ref[...]   # (L, 2*Cp)
    q = qctx[:, :Cp]
    ctx = qctx[:, Cp:]

    # Gates (C -> 2) stay OFF the MXU: VPU broadcast-mul + lane reduce on the 2-D xn (f32).
    g0 = jnp.sum(xn * wg_ref[0:1, :], axis=-1, keepdims=True) + bg_ref[:, 0:1]   # (L, 1)
    g1 = jnp.sum(xn * wg_ref[1:2, :], axis=-1, keepdims=True) + bg_ref[:, 1:2]   # (L, 1)

    # ------------- focal level 0: depthwise 3x3 conv (pad=1, no bias) + GELU -------------
    # Zero only the halo each step (interior is fully overwritten). NOT gated on program_id:
    # the scratch is per-core and the batch axis is megacore-parallel.
    zero_row = jnp.zeros((1, W + 2, Cp), jnp.float32)
    zero_col = jnp.zeros((H, 1, Cp), jnp.float32)
    pad_ref[0:1, _PADW - 1:_PADW + W + 1, :] = zero_row                 # top halo row
    pad_ref[H + 1:H + 2, _PADW - 1:_PADW + W + 1, :] = zero_row         # bottom halo row
    pad_ref[1:H + 1, _PADW - 1:_PADW, :] = zero_col                     # left halo column
    pad_ref[1:H + 1, _PADW + W:_PADW + W + 1, :] = zero_col             # right halo column
    pad_ref[1:H + 1, _PADW:_PADW + W, :] = ctx.reshape(H, W, Cp)        # aligned interior store

    # 3 sublane (kw) slices, each reused for the 3 cheap leading-axis (kh) shifts.
    acc = None
    for kw in range(3):
        c0 = _PADW - 1 + kw
        slab = pad_ref[:, c0:c0 + W, :]                                 # (H+2, W, Cp)
        for kh in range(3):
            k = kh * 3 + kw
            term = slab[kh:kh + H] * wdw_ref[k:k + 1, :]                # VPU MAC, f32
            acc = term if acc is None else acc + term
    ctx1 = _gelu(acc).reshape(L, Cp)                                    # (L, Cp)

    # ------------- gated aggregation (focal-level gate + global gate) -------------
    ctx_global = _gelu(jnp.mean(ctx1, axis=0, keepdims=True))           # (1, Cp)
    ctx_all = ctx1 * g0 + ctx_global * g1                               # (L, Cp)

    # ------------- modulator (1x1 conv) + modulation + proj -------------
    mod = jnp.dot(ctx_all.astype(jnp.bfloat16), wh_ref[...],
                  preferred_element_type=jnp.float32) + bh_ref[...]
    x_out = q * mod
    x_out = jnp.dot(x_out.astype(jnp.bfloat16), wp_ref[...],
                    preferred_element_type=jnp.float32) + bp_ref[...]

    # ------------- residual 1 (gamma_1 = 1.0, DropPath = identity) -------------
    x1 = x + x_out

    # ------------- MLP branch: norm2 -> fc1 -> GELU -> fc2; residual 2 -------------
    y = _layernorm_padded(x1, ln2_g_ref[...], ln2_b_ref[...], C, Cp)
    h = _gelu(jnp.dot(y.astype(jnp.bfloat16), w1_ref[...],
                      preferred_element_type=jnp.float32) + b1_ref[...])
    mlp = jnp.dot(h.astype(jnp.bfloat16), w2_ref[...],
                  preferred_element_type=jnp.float32) + b2_ref[...]

    out_ref[0] = (x1 + mlp).astype(out_ref.dtype)


def _vmem_limit_bytes():
    """Generation-aware scoped-VMEM budget (~40 MiB on 64 MiB v7x, ~100 MiB on 128 MiB parts)."""
    try:
        cap = int(pltpu.get_tpu_info().vmem_capacity_bytes)
    except Exception:  # conservative fallback if the query is unavailable
        cap = 64 * 1024 * 1024
    return int(min(100 * 1024 * 1024, max(32 * 1024 * 1024, cap - 24 * 1024 * 1024)))


def focalnet_block(x, params, H, W):
    """Eval-mode FocalNetBlock forward. x: (B, L, C) with L == H * W. Returns (B, L, C)."""
    B, L, C = x.shape
    Ch = params["w1"].shape[1]
    Cp = _round_up(C, _LANE)          # lane-dense channel dim
    Chp = _round_up(Ch, _LANE)        # lane-dense MLP hidden dim
    pitch = _round_up(_PADW + W + 1, _SUB)   # sublane-aligned scratch row pitch

    f32, bf16 = jnp.float32, jnp.bfloat16

    def pad2(a, rows, cols, dtype):
        a = jnp.asarray(a, dtype)
        return jnp.pad(a, ((0, rows - a.shape[0]), (0, cols - a.shape[1])))

    # Fused f-projection weights: [Wq | Wctx] -> (Cp, 2*Cp) bf16 (one wide MXU matmul).
    wqctx = jnp.concatenate([pad2(params["wq"], Cp, Cp, bf16),
                             pad2(params["wctx"], Cp, Cp, bf16)], axis=1)
    bqctx = jnp.concatenate([pad2(params["bq"], 1, Cp, f32),
                             pad2(params["bctx"], 1, Cp, f32)], axis=1)

    wg = pad2(params["wg"], 2, Cp, f32)
    bg = jnp.asarray(params["bg"], f32)                       # (1, 2)
    wdw = pad2(params["wdw_flat"], 9, Cp, f32)
    wh = pad2(params["wh"], Cp, Cp, bf16)
    bh = pad2(params["bh"], 1, Cp, f32)
    wp = pad2(params["wp"], Cp, Cp, bf16)
    bp = pad2(params["bp"], 1, Cp, f32)
    ln1_g = pad2(params["ln1_g"], 1, Cp, f32)
    ln1_b = pad2(params["ln1_b"], 1, Cp, f32)
    ln2_g = pad2(params["ln2_g"], 1, Cp, f32)
    ln2_b = pad2(params["ln2_b"], 1, Cp, f32)
    w1 = pad2(params["w1"], Cp, Chp, bf16)
    b1 = pad2(params["b1"], 1, Chp, f32)
    w2 = pad2(params["w2"], Chp, Cp, bf16)
    b2 = pad2(params["b2"], 1, Cp, f32)

    # Lane-dense input (padded channels are exactly zero -> LN compensation is exact).
    x_pad = jnp.pad(x.astype(f32), ((0, 0), (0, 0), (0, Cp - C)))

    def full(shape):
        zeros = (0,) * len(shape)
        return pl.BlockSpec(shape, lambda b, _z=zeros: _z)

    kernel = functools.partial(focalnet_block_kernel, H, W, C)

    out = pl.pallas_call(
        kernel,
        out_shape=jax.ShapeDtypeStruct((B, L, Cp), jnp.float32),
        grid_spec=pltpu.PrefetchScalarGridSpec(
            num_scalar_prefetch=0,
            grid=(B,),
            in_specs=[
                pl.BlockSpec((1, L, Cp), lambda b: (b, 0, 0)),   # x
                full((1, Cp)), full((1, Cp)),                    # norm1 gamma / beta
                full((Cp, 2 * Cp)), full((1, 2 * Cp)),           # fused f: [q|ctx] weight / bias
                full((2, Cp)), full((1, 2)),                     # f: gates weight / bias
                full((9, Cp)),                                   # depthwise 3x3 (flattened)
                full((Cp, Cp)), full((1, Cp)),                   # h (1x1 conv) weight / bias
                full((Cp, Cp)), full((1, Cp)),                   # proj weight / bias
                full((1, Cp)), full((1, Cp)),                    # norm2 gamma / beta
                full((Cp, Chp)), full((1, Chp)),                 # mlp fc1 weight / bias
                full((Chp, Cp)), full((1, Cp)),                  # mlp fc2 weight / bias
            ],
            out_specs=pl.BlockSpec((1, L, Cp), lambda b: (b, 0, 0)),
            scratch_shapes=[pltpu.VMEM((H + 2, pitch, Cp), jnp.float32)],
        ),
        compiler_params=pltpu.CompilerParams(
            dimension_semantics=("parallel",),     # batch elements independent -> both TCs
            vmem_limit_bytes=_vmem_limit_bytes(),
        ),
    )(x_pad,
      ln1_g, ln1_b,
      wqctx, bqctx,
      wg, bg,
      wdw,
      wh, bh,
      wp, bp,
      ln2_g, ln2_b,
      w1, b1,
      w2, b2)

    return out[:, :, :C]


def ref_forward(x, params, H, W):
    """Pure-JAX reference (eval mode, default config) with the same bf16-matmul numerics."""
    B, L, C = x.shape
    HI = lax.Precision.HIGHEST

    def ln(v, g, b, eps=1e-5):
        mu = v.mean(-1, keepdims=True)
        var = ((v - mu) ** 2).mean(-1, keepdims=True)
        return (v - mu) / jnp.sqrt(var + eps) * g + b

    def bdot(a, w):
        return jnp.dot(a.astype(jnp.bfloat16), w.astype(jnp.bfloat16),
                       preferred_element_type=jnp.float32)

    shortcut = x
    xn = ln(x, params["ln1_g"], params["ln1_b"])                       # (B, L, C)
    q = bdot(xn, params["wq"]) + params["bq"]
    ctx = bdot(xn, params["wctx"]) + params["bctx"]
    gates = jnp.dot(xn, params["wg"].T, precision=HI) + params["bg"]   # (B, L, 2) f32

    ctx4 = ctx.reshape(B, H, W, C)
    wdw = params["wdw"].reshape(3, 3, 1, C)                            # HWIO depthwise
    conv = lax.conv_general_dilated(
        ctx4, wdw, window_strides=(1, 1), padding=((1, 1), (1, 1)),
        dimension_numbers=("NHWC", "HWIO", "NHWC"), feature_group_count=C,
        precision=HI)
    ctx1 = _gelu(conv)                                                 # (B, H, W, C)

    g = gates.reshape(B, H, W, 2)
    ctx_all = ctx1 * g[..., 0:1]
    ctx_global = _gelu(ctx1.mean(axis=(1, 2), keepdims=True))          # (B, 1, 1, C)
    ctx_all = ctx_all + ctx_global * g[..., 1:2]

    mod = bdot(ctx_all.reshape(B, L, C), params["wh"]) + params["bh"]
    x_out = bdot(q * mod, params["wp"]) + params["bp"]
    x1 = shortcut + x_out

    y = ln(x1, params["ln2_g"], params["ln2_b"])
    h = _gelu(bdot(y, params["w1"]) + params["b1"])
    return x1 + bdot(h, params["w2"]) + params["b2"]


if __name__ == "__main__":
    B, C, H, W = 2, 32, 8, 8          # dim=32, input_resolution=(8, 8)
    L = H * W                          # tokens
    Ch = 4 * C                         # mlp hidden (mlp_ratio = 4.0)

    key = jax.random.PRNGKey(0)
    ks = jax.random.split(key, 20)
    s = 1.0 / float(C) ** 0.5

    x = jax.random.normal(ks[0], (B, L, C), jnp.float32)
    wdw = 0.2 * jax.random.normal(ks[9], (3, 3, C), jnp.float32)       # (kh, kw, c)
    params = {
        "ln1_g": 1.0 + 0.1 * jax.random.normal(ks[1], (1, C), jnp.float32),
        "ln1_b": 0.1 * jax.random.normal(ks[2], (1, C), jnp.float32),
        "wq":   s * jax.random.normal(ks[3], (C, C), jnp.float32),
        "bq":   0.1 * jax.random.normal(ks[4], (1, C), jnp.float32),
        "wctx": s * jax.random.normal(ks[5], (C, C), jnp.float32),
        "bctx": 0.1 * jax.random.normal(ks[6], (1, C), jnp.float32),
        "wg":   s * jax.random.normal(ks[7], (2, C), jnp.float32),
        "bg":   0.1 * jax.random.normal(ks[8], (1, 2), jnp.float32),
        "wdw":  wdw,
        "wdw_flat": wdw.reshape(9, C),
        "wh":   s * jax.random.normal(ks[10], (C, C), jnp.float32),
        "bh":   0.1 * jax.random.normal(ks[11], (1, C), jnp.float32),
        "wp":   s * jax.random.normal(ks[12], (C, C), jnp.float32),
        "bp":   0.1 * jax.random.normal(ks[13], (1, C), jnp.float32),
        "ln2_g": 1.0 + 0.1 * jax.random.normal(ks[14], (1, C), jnp.float32),
        "ln2_b": 0.1 * jax.random.normal(ks[15], (1, C), jnp.float32),
        "w1":   s * jax.random.normal(ks[16], (C, Ch), jnp.float32),
        "b1":   0.1 * jax.random.normal(ks[17], (1, Ch), jnp.float32),
        "w2":   (1.0 / float(Ch) ** 0.5) * jax.random.normal(ks[18], (Ch, C), jnp.float32),
        "b2":   0.1 * jax.random.normal(ks[19], (1, C), jnp.float32),
    }

    out = jax.block_until_ready(focalnet_block(x, params, H, W))
    ref = jax.block_until_ready(ref_forward(x, params, H, W))

    assert out.shape == (B, L, C)
    err = float(jnp.max(jnp.abs(out - ref)))
    assert jnp.allclose(out, ref, rtol=5e-3, atol=5e-3), f"max abs err {err}"
    print("KERNEL_OK")
</pallas_src>

<mosaic_0001>
module attributes {stable_mosaic.version = 11 : i64} {
  func.func @focalnet_block_kernel(%arg0: i32, %arg1: memref<1x64x128xf32, #tpu.memory_space<vmem>>, %arg2: memref<1x128xf32, #tpu.memory_space<vmem>>, %arg3: memref<1x128xf32, #tpu.memory_space<vmem>>, %arg4: memref<128x256xbf16, #tpu.memory_space<vmem>>, %arg5: memref<1x256xf32, #tpu.memory_space<vmem>>, %arg6: memref<2x128xf32, #tpu.memory_space<vmem>>, %arg7: memref<1x2xf32, #tpu.memory_space<vmem>>, %arg8: memref<9x128xf32, #tpu.memory_space<vmem>>, %arg9: memref<128x128xbf16, #tpu.memory_space<vmem>>, %arg10: memref<1x128xf32, #tpu.memory_space<vmem>>, %arg11: memref<128x128xbf16, #tpu.memory_space<vmem>>, %arg12: memref<1x128xf32, #tpu.memory_space<vmem>>, %arg13: memref<1x128xf32, #tpu.memory_space<vmem>>, %arg14: memref<1x128xf32, #tpu.memory_space<vmem>>, %arg15: memref<128x128xbf16, #tpu.memory_space<vmem>>, %arg16: memref<1x128xf32, #tpu.memory_space<vmem>>, %arg17: memref<128x128xbf16, #tpu.memory_space<vmem>>, %arg18: memref<1x128xf32, #tpu.memory_space<vmem>>, %arg19: memref<1x64x128xf32, #tpu.memory_space<vmem>>, %arg20: memref<10x24x128xf32, #tpu.memory_space<vmem>>) attributes {dimension_semantics = [#tpu.dimension_semantics<parallel>], iteration_bounds = array<i64: 2>, scalar_prefetch = 0 : i64, scratch_operands = 1 : i64, tpu.core_type = #tpu.core_type<tc>, window_params = [{transform_indices = @transform_0, window_bounds = array<i64: 1, 64, 128>}, {pipeline_mode = #tpu.pipeline_mode<synchronous>, transform_indices = @transform_1, window_bounds = array<i64: 1, 128>}, {pipeline_mode = #tpu.pipeline_mode<synchronous>, transform_indices = @transform_2, window_bounds = array<i64: 1, 128>}, {pipeline_mode = #tpu.pipeline_mode<synchronous>, transform_indices = @transform_3, window_bounds = array<i64: 128, 256>}, {pipeline_mode = #tpu.pipeline_mode<synchronous>, transform_indices = @transform_4, window_bounds = array<i64: 1, 256>}, {pipeline_mode = #tpu.pipeline_mode<synchronous>, transform_indices = @transform_5, window_bounds = array<i64: 2, 128>}, {pipeline_mode = #tpu.pipeline_mode<synchronous>, transform_indices = @transform_6, window_bounds = array<i64: 1, 2>}, {pipeline_mode = #tpu.pipeline_mode<synchronous>, transform_indices = @transform_7, window_bounds = array<i64: 9, 128>}, {pipeline_mode = #tpu.pipeline_mode<synchronous>, transform_indices = @transform_8, window_bounds = array<i64: 128, 128>}, {pipeline_mode = #tpu.pipeline_mode<synchronous>, transform_indices = @transform_9, window_bounds = array<i64: 1, 128>}, {pipeline_mode = #tpu.pipeline_mode<synchronous>, transform_indices = @transform_10, window_bounds = array<i64: 128, 128>}, {pipeline_mode = #tpu.pipeline_mode<synchronous>, transform_indices = @transform_11, window_bounds = array<i64: 1, 128>}, {pipeline_mode = #tpu.pipeline_mode<synchronous>, transform_indices = @transform_12, window_bounds = array<i64: 1, 128>}, {pipeline_mode = #tpu.pipeline_mode<synchronous>, transform_indices = @transform_13, window_bounds = array<i64: 1, 128>}, {pipeline_mode = #tpu.pipeline_mode<synchronous>, transform_indices = @transform_14, window_bounds = array<i64: 128, 128>}, {pipeline_mode = #tpu.pipeline_mode<synchronous>, transform_indices = @transform_15, window_bounds = array<i64: 1, 128>}, {pipeline_mode = #tpu.pipeline_mode<synchronous>, transform_indices = @transform_16, window_bounds = array<i64: 128, 128>}, {pipeline_mode = #tpu.pipeline_mode<synchronous>, transform_indices = @transform_17, window_bounds = array<i64: 1, 128>}, {transform_indices = @transform_18, window_bounds = array<i64: 1, 64, 128>}]} {
    %c0 = arith.constant 0 : index
    %c0_0 = arith.constant 0 : index
    %c0_1 = arith.constant 0 : index
    %0 = vector.load %arg1[%c0, %c0_0, %c0_1] : memref<1x64x128xf32, #tpu.memory_space<vmem>>, vector<1x64x128xf32>
    %1 = vector.shape_cast %0 : vector<1x64x128xf32> to vector<64x128xf32>
    %c0_2 = arith.constant 0 : index
    %c0_3 = arith.constant 0 : index
    %2 = vector.load %arg2[%c0_2, %c0_3] : memref<1x128xf32, #tpu.memory_space<vmem>>, vector<1x128xf32>
    %c0_4 = arith.constant 0 : index
    %c0_5 = arith.constant 0 : index
    %3 = vector.load %arg3[%c0_4, %c0_5] : memref<1x128xf32, #tpu.memory_space<vmem>>, vector<1x128xf32>
    %cst = arith.constant dense<0.000000e+00> : vector<64xf32>
    %4 = vector.multi_reduction <add>, %1, %cst [1] : vector<64x128xf32> to vector<64xf32>
    %5 = vector.shape_cast %4 : vector<64xf32> to vector<64x1xf32>
    %cst_6 = arith.constant 3.125000e-02 : f32
    %6 = vector.broadcast %cst_6 : f32 to vector<64x1xf32>
    %7 = arith.mulf %5, %6 : vector<64x1xf32>
    %8 = vector.broadcast %7 : vector<64x1xf32> to vector<64x128xf32>
    %9 = arith.subf %1, %8 : vector<64x128xf32>
    %10 = arith.mulf %9, %9 : vector<64x128xf32>
    %cst_7 = arith.constant dense<0.000000e+00> : vector<64xf32>
    %11 = vector.multi_reduction <add>, %10, %cst_7 [1] : vector<64x128xf32> to vector<64xf32>
    %12 = vector.shape_cast %11 : vector<64xf32> to vector<64x1xf32>
    %cst_8 = arith.constant 9.600000e+01 : f32
    %13 = vector.broadcast %cst_8 : f32 to vector<64x1xf32>
    %14 = arith.mulf %13, %7 : vector<64x1xf32>
    %15 = arith.mulf %14, %7 : vector<64x1xf32>
    %16 = arith.subf %12, %15 : vector<64x1xf32>
    %cst_9 = arith.constant 3.125000e-02 : f32
    %17 = vector.broadcast %cst_9 : f32 to vector<64x1xf32>
    %18 = arith.mulf %16, %17 : vector<64x1xf32>
    %cst_10 = arith.constant 9.99999974E-6 : f32
    %19 = vector.broadcast %cst_10 : f32 to vector<64x1xf32>
    %20 = arith.addf %18, %19 : vector<64x1xf32>
    %21 = math.rsqrt %20 : vector<64x1xf32>
    %22 = vector.broadcast %21 : vector<64x1xf32> to vector<64x128xf32>
    %23 = arith.mulf %9, %22 : vector<64x128xf32>
    %24 = vector.broadcast %2 : vector<1x128xf32> to vector<64x128xf32>
    %25 = arith.mulf %23, %24 : vector<64x128xf32>
    %26 = vector.broadcast %3 : vector<1x128xf32> to vector<64x128xf32>
    %27 = arith.addf %25, %26 : vector<64x128xf32>
    %28 = arith.truncf %27 : vector<64x128xf32> to vector<64x128xbf16>
    %c0_11 = arith.constant 0 : index
    %c0_12 = arith.constant 0 : index
    %29 = vector.load %arg4[%c0_11, %c0_12] : memref<128x256xbf16, #tpu.memory_space<vmem>>, vector<128x256xbf16>
    %cst_13 = arith.constant dense<0.000000e+00> : vector<64x256xf32>
    %30 = tpu.matmul %28, %29, %cst_13 {dimension_numbers = #tpu.dot_dimension_numbers<[1], [0], [0], [1], [0, 0, 1, 1], [], []>} : vector<64x128xbf16>, vector<128x256xbf16>, vector<64x256xf32> -> vector<64x256xf32>
    %c0_14 = arith.constant 0 : index
    %c0_15 = arith.constant 0 : index
    %31 = vector.load %arg5[%c0_14, %c0_15] : memref<1x256xf32, #tpu.memory_space<vmem>>, vector<1x256xf32>
    %32 = vector.broadcast %31 : vector<1x256xf32> to vector<64x256xf32>
    %33 = arith.addf %30, %32 : vector<64x256xf32>
    %34 = vector.extract_strided_slice %33 {offsets = [0, 0], sizes = [64, 128], strides = [1, 1]} : vector<64x256xf32> to vector<64x128xf32>
    %35 = vector.extract_strided_slice %33 {offsets = [0, 128], sizes = [64, 128], strides = [1, 1]} : vector<64x256xf32> to vector<64x128xf32>
    %c0_16 = arith.constant 0 : index
    %c0_17 = arith.constant 0 : index
    %36 = vector.load %arg6[%c0_16, %c0_17] : memref<2x128xf32, #tpu.memory_space<vmem>>, vector<1x128xf32>
    %37 = vector.broadcast %36 : vector<1x128xf32> to vector<64x128xf32>
    %38 = arith.mulf %27, %37 : vector<64x128xf32>
    %cst_18 = arith.constant dense<0.000000e+00> : vector<64xf32>
    %39 = vector.multi_reduction <add>, %38, %cst_18 [1] : vector<64x128xf32> to vector<64xf32>
    %40 = vector.shape_cast %39 : vector<64xf32> to vector<64x1xf32>
    %c0_19 = arith.constant 0 : index
    %c0_20 = arith.constant 0 : index
    %41 = vector.load %arg7[%c0_19, %c0_20] : memref<1x2xf32, #tpu.memory_space<vmem>>, vector<1x1xf32>
    %42 = vector.broadcast %41 : vector<1x1xf32> to vector<64x1xf32>
    %43 = arith.addf %40, %42 : vector<64x1xf32>
    %c1 = arith.constant 1 : index
    %c0_21 = arith.constant 0 : index
    %44 = vector.load %arg6[%c1, %c0_21] : memref<2x128xf32, #tpu.memory_space<vmem>>, vector<1x128xf32>
    %45 = vector.broadcast %44 : vector<1x128xf32> to vector<64x128xf32>
    %46 = arith.mulf %27, %45 : vector<64x128xf32>
    %cst_22 = arith.constant dense<0.000000e+00> : vector<64xf32>
    %47 = vector.multi_reduction <add>, %46, %cst_22 [1] : vector<64x128xf32> to vector<64xf32>
    %48 = vector.shape_cast %47 : vector<64xf32> to vector<64x1xf32>
    %c0_23 = arith.constant 0 : index
    %c1_24 = arith.constant 1 : index
    %49 = vector.load %arg7[%c0_23, %c1_24] : memref<1x2xf32, #tpu.memory_space<vmem>>, vector<1x1xf32>
    %50 = vector.broadcast %49 : vector<1x1xf32> to vector<64x1xf32>
    %51 = arith.addf %48, %50 : vector<64x1xf32>
    %cst_25 = arith.constant 0.000000e+00 : f32
    %52 = vector.broadcast %cst_25 : f32 to vector<1x10x128xf32>
    %cst_26 = arith.constant 0.000000e+00 : f32
    %53 = vector.broadcast %cst_26 : f32 to vector<8x1x128xf32>
    %c0_27 = arith.constant 0 : index
    %c7 = arith.constant 7 : index
    %c0_28 = arith.constant 0 : index
    %54 = vector.load %arg20[%c0_27, %c7, %c0_28] : memref<10x24x128xf32, #tpu.memory_space<vmem>>, vector<1x10x128xf32>
    tpu.vector_store %arg20[%c0_27, %c7, %c0_28], %52 {strides = array<i32>} : memref<10x24x128xf32, #tpu.memory_space<vmem>>, vector<1x10x128xf32>,
    %c9 = arith.constant 9 : index
    %c7_29 = arith.constant 7 : index
    %c0_30 = arith.constant 0 : index
    %55 = vector.load %arg20[%c9, %c7_29, %c0_30] : memref<10x24x128xf32, #tpu.memory_space<vmem>>, vector<1x10x128xf32>
    tpu.vector_store %arg20[%c9, %c7_29, %c0_30], %52 {strides = array<i32>} : memref<10x24x128xf32, #tpu.memory_space<vmem>>, vector<1x10x128xf32>,
    %c1_31 = arith.constant 1 : index
    %c7_32 = arith.constant 7 : index
    %c0_33 = arith.constant 0 : index
    %56 = vector.load %arg20[%c1_31, %c7_32, %c0_33] : memref<10x24x128xf32, #tpu.memory_space<vmem>>, vector<8x1x128xf32>
    tpu.vector_store %arg20[%c1_31, %c7_32, %c0_33], %53 {strides = array<i32>} : memref<10x24x128xf32, #tpu.memory_space<vmem>>, vector<8x1x128xf32>,
    %c1_34 = arith.constant 1 : index
    %c16 = arith.constant 16 : index
    %c0_35 = arith.constant 0 : index
    %57 = vector.load %arg20[%c1_34, %c16, %c0_35] : memref<10x24x128xf32, #tpu.memory_space<vmem>>, vector<8x1x128xf32>
    tpu.vector_store %arg20[%c1_34, %c16, %c0_35], %53 {strides = array<i32>} : memref<10x24x128xf32, #tpu.memory_space<vmem>>, vector<8x1x128xf32>,
    %58 = vector.shape_cast %35 : vector<64x128xf32> to vector<8x8x128xf32>
    %c1_36 = arith.constant 1 : index
    %c8 = arith.constant 8 : index
    %c0_37 = arith.constant 0 : index
    %59 = vector.load %arg20[%c1_36, %c8, %c0_37] : memref<10x24x128xf32, #tpu.memory_space<vmem>>, vector<8x8x128xf32>
    tpu.vector_store %arg20[%c1_36, %c8, %c0_37], %58 {strides = array<i32>} : memref<10x24x128xf32, #tpu.memory_space<vmem>>, vector<8x8x128xf32>,
    %c0_38 = arith.constant 0 : index
    %c7_39 = arith.constant 7 : index
    %c0_40 = arith.constant 0 : index
    %60 = vector.load %arg20[%c0_38, %c7_39, %c0_40] : memref<10x24x128xf32, #tpu.memory_space<vmem>>, vector<10x8x128xf32>
    %61 = vector.extract_strided_slice %60 {offsets = [0, 0, 0], sizes = [8, 8, 128], strides = [1, 1, 1]} : vector<10x8x128xf32> to vector<8x8x128xf32>
    %c0_41 = arith.constant 0 : index
    %c0_42 = arith.constant 0 : index
    %62 = vector.load %arg8[%c0_41, %c0_42] : memref<9x128xf32, #tpu.memory_space<vmem>>, vector<1x128xf32>
    %63 = vector.shape_cast %62 : vector<1x128xf32> to vector<1x1x128xf32>
    %64 = vector.broadcast %63 : vector<1x1x128xf32> to vector<8x8x128xf32>
    %65 = arith.mulf %61, %64 : vector<8x8x128xf32>
    %66 = vector.extract_strided_slice %60 {offsets = [1, 0, 0], sizes = [8, 8, 128], strides = [1, 1, 1]} : vector<10x8x128xf32> to vector<8x8x128xf32>
    %c3 = arith.constant 3 : index
    %c0_43 = arith.constant 0 : index
    %67 = vector.load %arg8[%c3, %c0_43] : memref<9x128xf32, #tpu.memory_space<vmem>>, vector<1x128xf32>
    %68 = vector.shape_cast %67 : vector<1x128xf32> to vector<1x1x128xf32>
    %69 = vector.broadcast %68 : vector<1x1x128xf32> to vector<8x8x128xf32>
    %70 = arith.mulf %66, %69 : vector<8x8x128xf32>
    %71 = arith.addf %65, %70 : vector<8x8x128xf32>
    %72 = vector.extract_strided_slice %60 {offsets = [2, 0, 0], sizes = [8, 8, 128], strides = [1, 1, 1]} : vector<10x8x128xf32> to vector<8x8x128xf32>
    %c6 = arith.constant 6 : index
    %c0_44 = arith.constant 0 : index
    %73 = vector.load %arg8[%c6, %c0_44] : memref<9x128xf32, #tpu.memory_space<vmem>>, vector<1x128xf32>
    %74 = vector.shape_cast %73 : vector<1x128xf32> to vector<1x1x128xf32>
    %75 = vector.broadcast %74 : vector<1x1x128xf32> to vector<8x8x128xf32>
    %76 = arith.mulf %72, %75 : vector<8x8x128xf32>
    %77 = arith.addf %71, %76 : vector<8x8x128xf32>
    %c0_45 = arith.constant 0 : index
    %c8_46 = arith.constant 8 : index
    %c0_47 = arith.constant 0 : index
    %78 = vector.load %arg20[%c0_45, %c8_46, %c0_47] : memref<10x24x128xf32, #tpu.memory_space<vmem>>, vector<10x8x128xf32>
    %79 = vector.extract_strided_slice %78 {offsets = [0, 0, 0], sizes = [8, 8, 128], strides = [1, 1, 1]} : vector<10x8x128xf32> to vector<8x8x128xf32>
    %c1_48 = arith.constant 1 : index
    %c0_49 = arith.constant 0 : index
    %80 = vector.load %arg8[%c1_48, %c0_49] : memref<9x128xf32, #tpu.memory_space<vmem>>, vector<1x128xf32>
    %81 = vector.shape_cast %80 : vector<1x128xf32> to vector<1x1x128xf32>
    %82 = vector.broadcast %81 : vector<1x1x128xf32> to vector<8x8x128xf32>
    %83 = arith.mulf %79, %82 : vector<8x8x128xf32>
    %84 = arith.addf %77, %83 : vector<8x8x128xf32>
    %85 = vector.extract_strided_slice %78 {offsets = [1, 0, 0], sizes = [8, 8, 128], strides = [1, 1, 1]} : vector<10x8x128xf32> to vector<8x8x128xf32>
    %c4 = arith.constant 4 : index
    %c0_50 = arith.constant 0 : index
    %86 = vector.load %arg8[%c4, %c0_50] : memref<9x128xf32, #tpu.memory_space<vmem>>, vector<1x128xf32>
    %87 = vector.shape_cast %86 : vector<1x128xf32> to vector<1x1x128xf32>
    %88 = vector.broadcast %87 : vector<1x1x128xf32> to vector<8x8x128xf32>
    %89 = arith.mulf %85, %88 : vector<8x8x128xf32>
    %90 = arith.addf %84, %89 : vector<8x8x128xf32>
    %91 = vector.extract_strided_slice %78 {offsets = [2, 0, 0], sizes = [8, 8, 128], strides = [1, 1, 1]} : vector<10x8x128xf32> to vector<8x8x128xf32>
    %c7_51 = arith.constant 7 : index
    %c0_52 = arith.constant 0 : index
    %92 = vector.load %arg8[%c7_51, %c0_52] : memref<9x128xf32, #tpu.memory_space<vmem>>, vector<1x128xf32>
    %93 = vector.shape_cast %92 : vector<1x128xf32> to vector<1x1x128xf32>
    %94 = vector.broadcast %93 : vector<1x1x128xf32> to vector<8x8x128xf32>
    %95 = arith.mulf %91, %94 : vector<8x8x128xf32>
    %96 = arith.addf %90, %95 : vector<8x8x128xf32>
    %c0_53 = arith.constant 0 : index
    %c9_54 = arith.constant 9 : index
    %c0_55 = arith.constant 0 : index
    %97 = vector.load %arg20[%c0_53, %c9_54, %c0_55] : memref<10x24x128xf32, #tpu.memory_space<vmem>>, vector<10x8x128xf32>
    %98 = vector.extract_strided_slice %97 {offsets = [0, 0, 0], sizes = [8, 8, 128], strides = [1, 1, 1]} : vector<10x8x128xf32> to vector<8x8x128xf32>
    %c2 = arith.constant 2 : index
    %c0_56 = arith.constant 0 : index
    %99 = vector.load %arg8[%c2, %c0_56] : memref<9x128xf32, #tpu.memory_space<vmem>>, vector<1x128xf32>
    %100 = vector.shape_cast %99 : vector<1x128xf32> to vector<1x1x128xf32>
    %101 = vector.broadcast %100 : vector<1x1x128xf32> to vector<8x8x128xf32>
    %102 = arith.mulf %98, %101 : vector<8x8x128xf32>
    %103 = arith.addf %96, %102 : vector<8x8x128xf32>
    %104 = vector.extract_strided_slice %97 {offsets = [1, 0, 0], sizes = [8, 8, 128], strides = [1, 1, 1]} : vector<10x8x128xf32> to vector<8x8x128xf32>
    %c5 = arith.constant 5 : index
    %c0_57 = arith.constant 0 : index
    %105 = vector.load %arg8[%c5, %c0_57] : memref<9x128xf32, #tpu.memory_space<vmem>>, vector<1x128xf32>
    %106 = vector.shape_cast %105 : vector<1x128xf32> to vector<1x1x128xf32>
    %107 = vector.broadcast %106 : vector<1x1x128xf32> to vector<8x8x128xf32>
    %108 = arith.mulf %104, %107 : vector<8x8x128xf32>
    %109 = arith.addf %103, %108 : vector<8x8x128xf32>
    %110 = vector.extract_strided_slice %97 {offsets = [2, 0, 0], sizes = [8, 8, 128], strides = [1, 1, 1]} : vector<10x8x128xf32> to vector<8x8x128xf32>
    %c8_58 = arith.constant 8 : index
    %c0_59 = arith.constant 0 : index
    %111 = vector.load %arg8[%c8_58, %c0_59] : memref<9x128xf32, #tpu.memory_space<vmem>>, vector<1x128xf32>
    %112 = vector.shape_cast %111 : vector<1x128xf32> to vector<1x1x128xf32>
    %113 = vector.broadcast %112 : vector<1x1x128xf32> to vector<8x8x128xf32>
    %114 = arith.mulf %110, %113 : vector<8x8x128xf32>
    %115 = arith.addf %109, %114 : vector<8x8x128xf32>
    %cst_60 = arith.constant 5.000000e-01 : f32
    %116 = vector.broadcast %cst_60 : f32 to vector<8x8x128xf32>
    %117 = arith.mulf %116, %115 : vector<8x8x128xf32>
    %cst_61 = arith.constant 4.471500e-02 : f32
    %118 = vector.broadcast %cst_61 : f32 to vector<8x8x128xf32>
    %119 = arith.mulf %118, %115 : vector<8x8x128xf32>
    %120 = arith.mulf %119, %115 : vector<8x8x128xf32>
    %121 = arith.mulf %120, %115 : vector<8x8x128xf32>
    %122 = arith.addf %115, %121 : vector<8x8x128xf32>
    %cst_62 = arith.constant 0.797884583 : f32
    %123 = vector.broadcast %cst_62 : f32 to vector<8x8x128xf32>
    %124 = arith.mulf %123, %122 : vector<8x8x128xf32>
    %125 = math.tanh %124 : vector<8x8x128xf32>
    %cst_63 = arith.constant 1.000000e+00 : f32
    %126 = vector.broadcast %cst_63 : f32 to vector<8x8x128xf32>
    %127 = arith.addf %126, %125 : vector<8x8x128xf32>
    %128 = arith.mulf %117, %127 : vector<8x8x128xf32>
    %129 = vector.shape_cast %128 : vector<8x8x128xf32> to vector<64x128xf32>
    %cst_64 = arith.constant dense<0.000000e+00> : vector<128xf32>
    %130 = vector.multi_reduction <add>, %129, %cst_64 [0] : vector<64x128xf32> to vector<128xf32>
    %131 = vector.shape_cast %130 : vector<128xf32> to vector<1x128xf32>
    %cst_65 = arith.constant 6.400000e+01 : f32
    %132 = vector.broadcast %cst_65 : f32 to vector<1x128xf32>
    %133 = arith.divf %131, %132 : vector<1x128xf32>
    %cst_66 = arith.constant 5.000000e-01 : f32
    %134 = vector.broadcast %cst_66 : f32 to vector<1x128xf32>
    %135 = arith.mulf %134, %133 : vector<1x128xf32>
    %cst_67 = arith.constant 4.471500e-02 : f32
    %136 = vector.broadcast %cst_67 : f32 to vector<1x128xf32>
    %137 = arith.mulf %136, %133 : vector<1x128xf32>
    %138 = arith.mulf %137, %133 : vector<1x128xf32>
    %139 = arith.mulf %138, %133 : vector<1x128xf32>
    %140 = arith.addf %133, %139 : vector<1x128xf32>
    %cst_68 = arith.constant 0.797884583 : f32
    %141 = vector.broadcast %cst_68 : f32 to vector<1x128xf32>
    %142 = arith.mulf %141, %140 : vector<1x128xf32>
    %143 = math.tanh %142 : vector<1x128xf32>
    %cst_69 = arith.constant 1.000000e+00 : f32
    %144 = vector.broadcast %cst_69 : f32 to vector<1x128xf32>
    %145 = arith.addf %144, %143 : vector<1x128xf32>
    %146 = arith.mulf %135, %145 : vector<1x128xf32>
    %147 = vector.broadcast %43 : vector<64x1xf32> to vector<64x128xf32>
    %148 = arith.mulf %129, %147 : vector<64x128xf32>
    %149 = vector.broadcast %146 : vector<1x128xf32> to vector<64x128xf32>
    %150 = vector.broadcast %51 : vector<64x1xf32> to vector<64x128xf32>
    %151 = arith.mulf %149, %150 : vector<64x128xf32>
    %152 = arith.addf %148, %151 : vector<64x128xf32>
    %153 = arith.truncf %152 : vector<64x128xf32> to vector<64x128xbf16>
    %c0_70 = arith.constant 0 : index
    %c0_71 = arith.constant 0 : index
    %154 = vector.load %arg9[%c0_70, %c0_71] : memref<128x128xbf16, #tpu.memory_space<vmem>>, vector<128x128xbf16>
    %cst_72 = arith.constant dense<0.000000e+00> : vector<64x128xf32>
    %155 = tpu.matmul %153, %154, %cst_72 {dimension_numbers = #tpu.dot_dimension_numbers<[1], [0], [0], [1], [0, 0, 1, 1], [], []>} : vector<64x128xbf16>, vector<128x128xbf16>, vector<64x128xf32> -> vector<64x128xf32>
    %c0_73 = arith.constant 0 : index
    %c0_74 = arith.constant 0 : index
    %156 = vector.load %arg10[%c0_73, %c0_74] : memref<1x128xf32, #tpu.memory_space<vmem>>, vector<1x128xf32>
    %157 = vector.broadcast %156 : vector<1x128xf32> to vector<64x128xf32>
    %158 = arith.addf %155, %157 : vector<64x128xf32>
    %159 = arith.mulf %34, %158 : vector<64x128xf32>
    %160 = arith.truncf %159 : vector<64x128xf32> to vector<64x128xbf16>
    %c0_75 = arith.constant 0 : index
    %c0_76 = arith.constant 0 : index
    %161 = vector.load %arg11[%c0_75, %c0_76] : memref<128x128xbf16, #tpu.memory_space<vmem>>, vector<128x128xbf16>
    %cst_77 = arith.constant dense<0.000000e+00> : vector<64x128xf32>
    %162 = tpu.matmul %160, %161, %cst_77 {dimension_numbers = #tpu.dot_dimension_numbers<[1], [0], [0], [1], [0, 0, 1, 1], [], []>} : vector<64x128xbf16>, vector<128x128xbf16>, vector<64x128xf32> -> vector<64x128xf32>
    %c0_78 = arith.constant 0 : index
    %c0_79 = arith.constant 0 : index
    %163 = vector.load %arg12[%c0_78, %c0_79] : memref<1x128xf32, #tpu.memory_space<vmem>>, vector<1x128xf32>
    %164 = vector.broadcast %163 : vector<1x128xf32> to vector<64x128xf32>
    %165 = arith.addf %162, %164 : vector<64x128xf32>
    %166 = arith.addf %1, %165 : vector<64x128xf32>
    %c0_80 = arith.constant 0 : index
    %c0_81 = arith.constant 0 : index
    %167 = vector.load %arg13[%c0_80, %c0_81] : memref<1x128xf32, #tpu.memory_space<vmem>>, vector<1x128xf32>
    %c0_82 = arith.constant 0 : index
    %c0_83 = arith.constant 0 : index
    %168 = vector.load %arg14[%c0_82, %c0_83] : memref<1x128xf32, #tpu.memory_space<vmem>>, vector<1x128xf32>
    %cst_84 = arith.constant dense<0.000000e+00> : vector<64xf32>
    %169 = vector.multi_reduction <add>, %166, %cst_84 [1] : vector<64x128xf32> to vector<64xf32>
    %170 = vector.shape_cast %169 : vector<64xf32> to vector<64x1xf32>
    %cst_85 = arith.constant 3.125000e-02 : f32
    %171 = vector.broadcast %cst_85 : f32 to vector<64x1xf32>
    %172 = arith.mulf %170, %171 : vector<64x1xf32>
    %173 = vector.broadcast %172 : vector<64x1xf32> to vector<64x128xf32>
    %174 = arith.subf %166, %173 : vector<64x128xf32>
    %175 = arith.mulf %174, %174 : vector<64x128xf32>
    %cst_86 = arith.constant dense<0.000000e+00> : vector<64xf32>
    %176 = vector.multi_reduction <add>, %175, %cst_86 [1] : vector<64x128xf32> to vector<64xf32>
    %177 = vector.shape_cast %176 : vector<64xf32> to vector<64x1xf32>
    %cst_87 = arith.constant 9.600000e+01 : f32
    %178 = vector.broadcast %cst_87 : f32 to vector<64x1xf32>
    %179 = arith.mulf %178, %172 : vector<64x1xf32>
    %180 = arith.mulf %179, %172 : vector<64x1xf32>
    %181 = arith.subf %177, %180 : vector<64x1xf32>
    %cst_88 = arith.constant 3.125000e-02 : f32
    %182 = vector.broadcast %cst_88 : f32 to vector<64x1xf32>
    %183 = arith.mulf %181, %182 : vector<64x1xf32>
    %cst_89 = arith.constant 9.99999974E-6 : f32
    %184 = vector.broadcast %cst_89 : f32 to vector<64x1xf32>
    %185 = arith.addf %183, %184 : vector<64x1xf32>
    %186 = math.rsqrt %185 : vector<64x1xf32>
    %187 = vector.broadcast %186 : vector<64x1xf32> to vector<64x128xf32>
    %188 = arith.mulf %174, %187 : vector<64x128xf32>
    %189 = vector.broadcast %167 : vector<1x128xf32> to vector<64x128xf32>
    %190 = arith.mulf %188, %189 : vector<64x128xf32>
    %191 = vector.broadcast %168 : vector<1x128xf32> to vector<64x128xf32>
    %192 = arith.addf %190, %191 : vector<64x128xf32>
    %193 = arith.truncf %192 : vector<64x128xf32> to vector<64x128xbf16>
    %c0_90 = arith.constant 0 : index
    %c0_91 = arith.constant 0 : index
    %194 = vector.load %arg15[%c0_90, %c0_91] : memref<128x128xbf16, #tpu.memory_space<vmem>>, vector<128x128xbf16>
    %cst_92 = arith.constant dense<0.000000e+00> : vector<64x128xf32>
    %195 = tpu.matmul %193, %194, %cst_92 {dimension_numbers = #tpu.dot_dimension_numbers<[1], [0], [0], [1], [0, 0, 1, 1], [], []>} : vector<64x128xbf16>, vector<128x128xbf16>, vector<64x128xf32> -> vector<64x128xf32>
    %c0_93 = arith.constant 0 : index
    %c0_94 = arith.constant 0 : index
    %196 = vector.load %arg16[%c0_93, %c0_94] : memref<1x128xf32, #tpu.memory_space<vmem>>, vector<1x128xf32>
    %197 = vector.broadcast %196 : vector<1x128xf32> to vector<64x128xf32>
    %198 = arith.addf %195, %197 : vector<64x128xf32>
    %cst_95 = arith.constant 5.000000e-01 : f32
    %199 = vector.broadcast %cst_95 : f32 to vector<64x128xf32>
    %200 = arith.mulf %199, %198 : vector<64x128xf32>
    %cst_96 = arith.constant 4.471500e-02 : f32
    %201 = vector.broadcast %cst_96 : f32 to vector<64x128xf32>
    %202 = arith.mulf %201, %198 : vector<64x128xf32>
    %203 = arith.mulf %202, %198 : vector<64x128xf32>
    %204 = arith.mulf %203, %198 : vector<64x128xf32>
    %205 = arith.addf %198, %204 : vector<64x128xf32>
    %cst_97 = arith.constant 0.797884583 : f32
    %206 = vector.broadcast %cst_97 : f32 to vector<64x128xf32>
    %207 = arith.mulf %206, %205 : vector<64x128xf32>
    %208 = math.tanh %207 : vector<64x128xf32>
    %cst_98 = arith.constant 1.000000e+00 : f32
    %209 = vector.broadcast %cst_98 : f32 to vector<64x128xf32>
    %210 = arith.addf %209, %208 : vector<64x128xf32>
    %211 = arith.mulf %200, %210 : vector<64x128xf32>
    %212 = arith.truncf %211 : vector<64x128xf32> to vector<64x128xbf16>
    %c0_99 = arith.constant 0 : index
    %c0_100 = arith.constant 0 : index
    %213 = vector.load %arg17[%c0_99, %c0_100] : memref<128x128xbf16, #tpu.memory_space<vmem>>, vector<128x128xbf16>
    %cst_101 = arith.constant dense<0.000000e+00> : vector<64x128xf32>
    %214 = tpu.matmul %212, %213, %cst_101 {dimension_numbers = #tpu.dot_dimension_numbers<[1], [0], [0], [1], [0, 0, 1, 1], [], []>} : vector<64x128xbf16>, vector<128x128xbf16>, vector<64x128xf32> -> vector<64x128xf32>
    %c0_102 = arith.constant 0 : index
    %c0_103 = arith.constant 0 : index
    %215 = vector.load %arg18[%c0_102, %c0_103] : memref<1x128xf32, #tpu.memory_space<vmem>>, vector<1x128xf32>
    %216 = vector.broadcast %215 : vector<1x128xf32> to vector<64x128xf32>
    %217 = arith.addf %214, %216 : vector<64x128xf32>
    %218 = arith.addf %166, %217 : vector<64x128xf32>
    %c0_104 = arith.constant 0 : index
    %c0_105 = arith.constant 0 : index
    %c0_106 = arith.constant 0 : index
    %219 = vector.load %arg19[%c0_104, %c0_105, %c0_106] : memref<1x64x128xf32, #tpu.memory_space<vmem>>, vector<1x64x128xf32>
    %220 = vector.shape_cast %219 : vector<1x64x128xf32> to vector<64x128xf32>
    %221 = vector.shape_cast %218 : vector<64x128xf32> to vector<1x64x128xf32>
    tpu.vector_store %arg19[%c0_104, %c0_105, %c0_106], %221 {strides = array<i32>} : memref<1x64x128xf32, #tpu.memory_space<vmem>>, vector<1x64x128xf32>,
    return
  }
  func.func @transform_0(%arg0: i32) -> (i32, i32, i32) {
    %c0_i32 = arith.constant 0 : i32
    %c0_i32_0 = arith.constant 0 : i32
    %c0_i32_1 = arith.constant 0 : i32
    return %arg0, %c0_i32, %c0_i32_0 : i32, i32, i32
  }
  func.func @transform_1(%arg0: i32) -> (i32, i32) {
    %c0_i32 = arith.constant 0 : i32
    %c0_i32_0 = arith.constant 0 : i32
    %c0_i32_1 = arith.constant 0 : i32
    return %c0_i32, %c0_i32_0 : i32, i32
  }
  func.func @transform_2(%arg0: i32) -> (i32, i32) {
    %c0_i32 = arith.constant 0 : i32
    %c0_i32_0 = arith.constant 0 : i32
    %c0_i32_1 = arith.constant 0 : i32
    return %c0_i32, %c0_i32_0 : i32, i32
  }
  func.func @transform_3(%arg0: i32) -> (i32, i32) {
    %c0_i32 = arith.constant 0 : i32
    %c0_i32_0 = arith.constant 0 : i32
    %c0_i32_1 = arith.constant 0 : i32
    return %c0_i32, %c0_i32_0 : i32, i32
  }
  func.func @transform_4(%arg0: i32) -> (i32, i32) {
    %c0_i32 = arith.constant 0 : i32
    %c0_i32_0 = arith.constant 0 : i32
    %c0_i32_1 = arith.constant 0 : i32
    return %c0_i32, %c0_i32_0 : i32, i32
  }
  func.func @transform_5(%arg0: i32) -> (i32, i32) {
    %c0_i32 = arith.constant 0 : i32
    %c0_i32_0 = arith.constant 0 : i32
    %c0_i32_1 = arith.constant 0 : i32
    return %c0_i32, %c0_i32_0 : i32, i32
  }
  func.func @transform_6(%arg0: i32) -> (i32, i32) {
    %c0_i32 = arith.constant 0 : i32
    %c0_i32_0 = arith.constant 0 : i32
    %c0_i32_1 = arith.constant 0 : i32
    return %c0_i32, %c0_i32_0 : i32, i32
  }
  func.func @transform_7(%arg0: i32) -> (i32, i32) {
    %c0_i32 = arith.constant 0 : i32
    %c0_i32_0 = arith.constant 0 : i32
    %c0_i32_1 = arith.constant 0 : i32
    return %c0_i32, %c0_i32_0 : i32, i32
  }
  func.func @transform_8(%arg0: i32) -> (i32, i32) {
    %c0_i32 = arith.constant 0 : i32
    %c0_i32_0 = arith.constant 0 : i32
    %c0_i32_1 = arith.constant 0 : i32
    return %c0_i32, %c0_i32_0 : i32, i32
  }
  func.func @transform_9(%arg0: i32) -> (i32, i32) {
    %c0_i32 = arith.constant 0 : i32
    %c0_i32_0 = arith.constant 0 : i32
    %c0_i32_1 = arith.constant 0 : i32
    return %c0_i32, %c0_i32_0 : i32, i32
  }
  func.func @transform_10(%arg0: i32) -> (i32, i32) {
    %c0_i32 = arith.constant 0 : i32
    %c0_i32_0 = arith.constant 0 : i32
    %c0_i32_1 = arith.constant 0 : i32
    return %c0_i32, %c0_i32_0 : i32, i32
  }
  func.func @transform_11(%arg0: i32) -> (i32, i32) {
    %c0_i32 = arith.constant 0 : i32
    %c0_i32_0 = arith.constant 0 : i32
    %c0_i32_1 = arith.constant 0 : i32
    return %c0_i32, %c0_i32_0 : i32, i32
  }
  func.func @transform_12(%arg0: i32) -> (i32, i32) {
    %c0_i32 = arith.constant 0 : i32
    %c0_i32_0 = arith.constant 0 : i32
    %c0_i32_1 = arith.constant 0 : i32
    return %c0_i32, %c0_i32_0 : i32, i32
  }
  func.func @transform_13(%arg0: i32) -> (i32, i32) {
    %c0_i32 = arith.constant 0 : i32
    %c0_i32_0 = arith.constant 0 : i32
    %c0_i32_1 = arith.constant 0 : i32
    return %c0_i32, %c0_i32_0 : i32, i32
  }
  func.func @transform_14(%arg0: i32) -> (i32, i32) {
    %c0_i32 = arith.constant 0 : i32
    %c0_i32_0 = arith.constant 0 : i32
    %c0_i32_1 = arith.constant 0 : i32
    return %c0_i32, %c0_i32_0 : i32, i32
  }
  func.func @transform_15(%arg0: i32) -> (i32, i32) {
    %c0_i32 = arith.constant 0 : i32
    %c0_i32_0 = arith.constant 0 : i32
    %c0_i32_1 = arith.constant 0 : i32
    return %c0_i32, %c0_i32_0 : i32, i32
  }
  func.func @transform_16(%arg0: i32) -> (i32, i32) {
    %c0_i32 = arith.constant 0 : i32
    %c0_i32_0 = arith.constant 0 : i32
    %c0_i32_1 = arith.constant 0 : i32
    return %c0_i32, %c0_i32_0 : i32, i32
  }
  func.func @transform_17(%arg0: i32) -> (i32, i32) {
    %c0_i32 = arith.constant 0 : i32
    %c0_i32_0 = arith.constant 0 : i32
    %c0_i32_1 = arith.constant 0 : i32
    return %c0_i32, %c0_i32_0 : i32, i32
  }
  func.func @transform_18(%arg0: i32) -> (i32, i32, i32) {
    %c0_i32 = arith.constant 0 : i32
    %c0_i32_0 = arith.constant 0 : i32
    %c0_i32_1 = arith.constant 0 : i32
    return %arg0, %c0_i32, %c0_i32_0 : i32, i32, i32
  }
}

</mosaic_0001>

<bundles_post_ra>
// kernel: tpu_custom_call.1
= control target key start
LH: loop header
LB: loop body
LE: loop exit
PB: predicated region body
PF: predicated region fallthrough
CT: control target
= control target key end

     0   :  { %s4244_s0 = inlined_call_operand.hbm [shape: f32[2,64,128], index: 0, kind: input, shape index: {}]   ;;  %s4245_s1 = inlined_call_operand.vmem [shape: f32[1,128], index: 1, kind: input, shape index: {}]   ;;  %s4246_s2 = inlined_call_operand.vmem [shape: f32[1,128], index: 2, kind: input, shape index: {}]   ;;  %s4247_s3 = inlined_call_operand.hbm [shape: bf16[128,256], index: 3, kind: input, shape index: {}]   ;;  %s4248_s4 = inlined_call_operand.vmem [shape: f32[1,256], index: 4, kind: input, shape index: {}]   ;;  %s4249_s5 = inlined_call_operand.vmem [shape: f32[2,128], index: 5, kind: input, shape index: {}]   ;;  %s4250_s6 = inlined_call_operand.vmem [shape: f32[1,2], index: 6, kind: input, shape index: {}]   ;;  %s4251_s7 = inlined_call_operand.vmem [shape: f32[9,128], index: 7, kind: input, shape index: {}]   ;;  %s4252_s8 = inlined_call_operand.hbm [shape: bf16[128,128], index: 8, kind: input, shape index: {}]   ;;  %s4253_s9 = inlined_call_operand.vmem [shape: f32[1,128], index: 9, kind: input, shape index: {}]   ;;  %s4254_s10 = inlined_call_operand.hbm [shape: bf16[128,128], index: 10, kind: input, shape index: {}]   ;;  %s4255_s11 = inlined_call_operand.vmem [shape: f32[1,128], index: 11, kind: input, shape index: {}]   ;;  %s4256_s12 = inlined_call_operand.vmem [shape: f32[1,128], index: 12, kind: input, shape index: {}]   ;;  %s4257_s13 = inlined_call_operand.vmem [shape: f32[1,128], index: 13, kind: input, shape index: {}]   ;;  %s4258_s14 = inlined_call_operand.hbm [shape: bf16[128,128], index: 14, kind: input, shape index: {}]   ;;  %s4259_s15 = inlined_call_operand.vmem [shape: f32[1,128], index: 15, kind: input, shape index: {}]   ;;  %s4260_s16 = inlined_call_operand.hbm [shape: bf16[128,128], index: 16, kind: input, shape index: {}]   ;;  %s4261_s17 = inlined_call_operand.vmem [shape: f32[1,128], index: 17, kind: input, shape index: {}]   ;;  %s4262_s18 = inlined_call_operand.hbm [shape: f32[2,64,128], index: 18, kind: output, shape index: {}]  }
   0x1   :  { %4270 = sst [smem:[#allocation20_spill]] %s4244_s0 }
   0x2   :  { %4271 = sst [smem:[#allocation21_spill]] %s4245_s1 }
   0x3   :  { %4272 = sst [smem:[#allocation22_spill]] %s4246_s2 }
   0x4   :  { %4273 = sst [smem:[#allocation23_spill]] %s4247_s3 }
   0x5   :  { %4274 = sst [smem:[#allocation24_spill]] %s4253_s9 }
   0x6   :  { %4275 = sst [smem:[#allocation25_spill]] %s4255_s11 }
   0x7   :  { %4276 = sst [smem:[#allocation26_spill]] %s4256_s12 }
   0x8   :  { %4277 = sst [smem:[#allocation27_spill]] %s4257_s13 }
   0x9   :  { %4278 = sst [smem:[#allocation28_spill]] %s4259_s15 }
   0xa   :  { %4279 = sst [smem:[#allocation29_spill]] %s4261_s17 }
   0xb   :  { %4280 = sst [smem:[#allocation30_spill]] %s4262_s18 }
   0xc   :  { %23 = vsyncpa [#allocation4], 0 }
   0xd   :  { %25 = vsyncpa [#allocation4 + $0x1], 0 }
   0xe   :  { %26 = vsyncpa [#allocation7], 0 }
   0xf   :  { %27 = vsyncpa [#allocation10], 0 }
  0x10   :  { %28 = vsyncpa [#allocation13], 0 }
  0x11   :  { %29 = vsyncpa [#allocation5], 0 }
  0x12   :  { %31 = vsyncpa [#allocation5 + $0x1], 0  ;;  %s3327_s27 = smov 0   ;;  %s3329_s28 = smov 0  }
  0x13   :  { %s3331_s29 = smov 0   ;;  %s3333_s30 = smov 0  }
  0x14 LB: > { %s3216_s0 = smov [#allocation6]   ;;  %s3348_s1 = sadd.s32 4294967295, %s3214_s30   ;;  %s3214_s30 = sphi %s3333_s30, %s4315_s30   ;;  %s3210_s29 = sphi %s3331_s29, %s4314_s29   ;;  %s3206_s28 = sphi %s3329_s28, %s4313_s28   ;;  %s3202_s27 = sphi %s3327_s27, %s4312_s27  }
  0x15   : > { %s469_s19 = sshll.u32 %s3216_s0, 4  ;;  %p2467_p0 = scmp.ge.s32.totalorder %s3214_s30, 1  ;;  %s3353_s19 = int_to_ptr.vmem [resolvable:$true] %s469_s19 }
  0x16   : > { %p4266_p1 = scmp.eq.s32.totalorder %s3348_s1, 0  ;;  %p451_p2 = scmp.lt.s32.totalorder %s3214_s30, 3 }
  0x17   : > { %s3217_s22 = smov [#allocation9]   ;;  %s3218_s23 = smov [#allocation8]  }
  0x18   : > { %p3355_p3 = pnand %p2467_p0, %p451_p2  ;;  %s510_s2 = sshll.u32 %s3217_s22, 4  ;;  %s3368_s2 = int_to_ptr.vmem [resolvable:$true] %s510_s2 }
  0x19   : > { %s3370_s24 = sshll.u32 %s3218_s23, 4  ;;  %s4283_s3 = sld [smem:[#allocation23_spill]]  ;;  %s495_s24 = int_to_ptr.vmem [resolvable:$true] %s3370_s24 }
  0x1a   : > { %s4281_s20 = scalar_select %p3355_p3, 1, 0 }
  0x1b   : > { %p2744_p5 = pneg %p3355_p3 }
  0x1d   : > { %p3364_p6 = pnand %p2744_p5, %p4266_p1 }
  0x1f   : > { %s2966_s0 = scalar_lea.hbm %s4283_s3, 2048  ;;  %p3380_p8 = pneg %p3364_p6 }
  0x20   : > { %p2967_p7 = scmp.ne.s32.totalorder %s4283_s3, %s2966_s0  ;;  %p2973_p11 = scmp.lt.u32.totalorder %s2966_s0, %s4283_s3 }
  0x22   : > { %p2969_p9 = pnand %p3380_p8, %p2967_p7 }
  0x24   : > { %p2970_p10 = pneg %p2969_p9 }
  0x26   : > { %p2975_p12 = pnand %p2973_p11, %p2970_p10 }
  0x28   : > { %2978 = shalt.err (!%p2975_p12)
}
  0x29   : > { %s2979_s17 = scalar_lea.vmem %s3353_s19, 2048  ;;  %p2987_p5 = scmp.lt.s32.totalorder %s3353_s19, %s3353_s19 }
  0x2a   : > { %p2980_p13 = scmp.ne.s32.totalorder %s3353_s19, %s2979_s17  ;;  %p2988_p4 = scmp.lt.s32.totalorder %s2979_s17, %s2979_s17 }
  0x2c   : > { %p2982_p0 = pnand %p2980_p13, %p3380_p8  ;;  %p2989_p7 = por %p2988_p4, %p2987_p5 }
  0x2e   : > { %p2983_p2 = pneg %p2982_p0 }
  0x30   : > { %p2990_p9 = pnand %p2989_p7, %p2983_p2 }
  0x32   : > { %2993 = shalt.err (!%p2990_p9)
}
  0x33   : > { %s4265_s18 = smov 128   ;;  %s4268_s25 = smov 8  }
  0x34   : > { %2747 = dma.hbm_to_vmem [thread:$0]  (!%p3364_p6), %s4283_s3, 2048, %s3353_s19, [#allocation7], %s4265_s18, %s4265_s18, %s4268_s25  }
  0x35   : > { %s2994_s17 = scalar_lea.hbm %s4254_s10, 1024 }
  0x36   : > { %p2995_p4 = scmp.ne.s32.totalorder %s4254_s10, %s2994_s17  ;;  %p3001_p12 = scmp.lt.u32.totalorder %s2994_s17, %s4254_s10 }
  0x38   : > { %p2997_p10 = pnand %p2995_p4, %p3380_p8 }
  0x3a   : > { %p2998_p11 = pneg %p2997_p10 }
  0x3c   : > { %p3003_p13 = pnand %p3001_p12, %p2998_p11 }
  0x3e   : > { %3006 = shalt.err (!%p3003_p13)
}
  0x3f   : > { %s3007_s19 = scalar_lea.vmem %s3368_s2, 1024  ;;  %p3015_p7 = scmp.lt.s32.totalorder %s3368_s2, %s3368_s2 }
  0x40   : > { %p3008_p0 = scmp.ne.s32.totalorder %s3368_s2, %s3007_s19  ;;  %p3016_p9 = scmp.lt.s32.totalorder %s3007_s19, %s3007_s19 }
  0x42   : > { %p3010_p2 = pnand %p3008_p0, %p3380_p8  ;;  %p3017_p4 = por %p3016_p9, %p3015_p7 }
  0x44   : > { %p3011_p5 = pneg %p3010_p2 }
  0x46   : > { %p3018_p10 = pnand %p3017_p4, %p3011_p5 }
  0x48   : > { %3021 = shalt.err (!%p3018_p10)
}
  0x49   : > { %s3221_s12 = smov 64   ;;  %s3222_s9 = smov 4  }
  0x4a   : > { %2753 = dma.hbm_to_vmem [thread:$0]  (!%p3364_p6), %s4254_s10, 1024, %s3368_s2, [#allocation10], %s3221_s12, %s3221_s12, %s3222_s9  }
  0x4b   : > { %s3022_s22 = scalar_lea.hbm %s4252_s8, 1024 }
  0x4c   : > { %p3023_p11 = scmp.ne.s32.totalorder %s4252_s8, %s3022_s22  ;;  %p3029_p0 = scmp.lt.u32.totalorder %s3022_s22, %s4252_s8 }
  0x4e   : > { %p3025_p12 = pnand %p3023_p11, %p3380_p8 }
  0x50   : > { %p3026_p13 = pneg %p3025_p12 }
  0x52   : > { %p3031_p2 = pnand %p3029_p0, %p3026_p13 }
  0x54   : > { %3034 = shalt.err (!%p3031_p2)
}
  0x55   : > { %s3035_s11 = scalar_lea.vmem %s495_s24, 1024  ;;  %p3043_p4 = scmp.lt.s32.totalorder %s495_s24, %s495_s24 }
  0x56   : > { %p3036_p5 = scmp.ne.s32.totalorder %s495_s24, %s3035_s11  ;;  %p3044_p10 = scmp.lt.s32.totalorder %s3035_s11, %s3035_s11 }
  0x58   : > { %p3038_p7 = pnand %p3036_p5, %p3380_p8  ;;  %p3045_p1 = por %p3044_p10, %p3043_p4 }
  0x5a   : > { %p3039_p9 = pneg %p3038_p7 }
  0x5c   : > { %p3046_p3 = pnand %p3045_p1, %p3039_p9 }
  0x5e   : > { %3049 = shalt.err (!%p3046_p3)
}
  0x5f   : > { %2750 = dma.hbm_to_vmem [thread:$0]  (!%p3364_p6), %s4252_s8, 1024, %s495_s24, [#allocation7], %s3221_s12, %s3221_s12, %s3222_s9  }
  0x60   : > { %s3223_s13 = smov [#allocation11]   ;;  %s3224_s0 = smov [#allocation12]  }
  0x61   : > { %s532_s26 = sshll.u32 %s3223_s13, 4  ;;  %s548_s22 = sshll.u32 %s3224_s0, 4  ;;  %s533_s26 = int_to_ptr.vmem [resolvable:$true] %s532_s26  ;;  %s549_s22 = int_to_ptr.vmem [resolvable:$true] %s548_s22 }
  0x62   : > { %s3050_s19 = scalar_lea.hbm %s4258_s14, 1024 }
  0x63   : > { %p3051_p1 = scmp.ne.s32.totalorder %s4258_s14, %s3050_s19  ;;  %p3057_p12 = scmp.lt.u32.totalorder %s3050_s19, %s4258_s14 }
  0x65   : > { %p3053_p3 = pnand %p3051_p1, %p3380_p8 }
  0x67   : > { %p3054_p11 = pneg %p3053_p3 }
  0x69   : > { %p3059_p13 = pnand %p3057_p12, %p3054_p11 }
  0x6b   : > { %3062 = shalt.err (!%p3059_p13)
}
  0x6c   : > { %s3063_s24 = scalar_lea.vmem %s533_s26, 1024  ;;  %p3071_p7 = scmp.lt.s32.totalorder %s533_s26, %s533_s26 }
  0x6d   : > { %p3064_p0 = scmp.ne.s32.totalorder %s533_s26, %s3063_s24  ;;  %p3072_p9 = scmp.lt.s32.totalorder %s3063_s24, %s3063_s24 }
  0x6f   : > { %p3066_p2 = pnand %p3064_p0, %p3380_p8  ;;  %p3073_p4 = por %p3072_p9, %p3071_p7 }
  0x71   : > { %p3067_p5 = pneg %p3066_p2 }
  0x73   : > { %p3074_p10 = pnand %p3073_p4, %p3067_p5 }
  0x75   : > { %3077 = shalt.err (!%p3074_p10)
}
  0x76   : > { %2756 = dma.hbm_to_vmem [thread:$0]  (!%p3364_p6), %s4258_s14, 1024, %s533_s26, [#allocation10], %s3221_s12, %s3221_s12, %s3222_s9  }
  0x77   : > { %s3078_s0 = scalar_lea.hbm %s4260_s16, 1024 }
  0x78   : > { %p3079_p1 = scmp.ne.s32.totalorder %s4260_s16, %s3078_s0  ;;  %p3085_p12 = scmp.lt.u32.totalorder %s3078_s0, %s4260_s16 }
  0x7a   : > { %p3081_p3 = pnand %p3079_p1, %p3380_p8 }
  0x7c   : > { %p3082_p11 = pneg %p3081_p3 }
  0x7e   : > { %p3087_p13 = pnand %p3085_p12, %p3082_p11 }
  0x80   : > { %3090 = shalt.err (!%p3087_p13)
}
  0x81   : > { %s3091_s2 = scalar_lea.vmem %s549_s22, 1024  ;;  %p3099_p7 = scmp.lt.s32.totalorder %s549_s22, %s549_s22 }
  0x82   : > { %p3092_p0 = scmp.ne.s32.totalorder %s549_s22, %s3091_s2  ;;  %p3100_p9 = scmp.lt.s32.totalorder %s3091_s2, %s3091_s2 }
  0x84   : > { %p3094_p2 = pnand %p3092_p0, %p3380_p8  ;;  %p3101_p4 = por %p3100_p9, %p3099_p7 }
  0x86   : > { %p3095_p5 = pneg %p3094_p2 }
  0x88   : > { %p3102_p10 = pnand %p3101_p4, %p3095_p5 }
  0x8a   : > { %3105 = shalt.err (!%p3102_p10)
}
  0x8b   : > { %2759 = dma.hbm_to_vmem [thread:$0]  (!%p3364_p6), %s4260_s16, 1024, %s549_s22, [#allocation13], %s3221_s12, %s3221_s12, %s3222_s9  }
  0x8c   : > { %s2466_s15 = sadd.s32 4294967294, %s3214_s30   ;;  %s3496_s21 = sadd.s32 1, %s3214_s30  }
  0x8d   : > { %s44_s3 = sadd.s32 1, %s3210_s29  ;;  %s41_s25 = ssub.s32 %s3214_s30, %s3496_s21 }
  0x8e   : > { %p51_p8 = scmp.ne.s32.totalorder %s3210_s29, %s3206_s28  ;;  %p42_p1 = scmp.eq.s32.totalorder %s41_s25, 0 }
  0x8f   : > { %p52_p3 = scmp.eq.s32.totalorder %s3214_s30, 0  ;;  %p57_p11 = scmp.ne.s32.totalorder %s3206_s28, %s3202_s27 }
  0x90   : > { %p438_p12 = scmp.eq.s32.totalorder %s3348_s1, 1  ;;  %p4285_p0 = scmp.eq.s32.totalorder %s3348_s1, 0 }
  0x91   : > { %s3508_s18 = scalar_select %p42_p1, %s3210_s29, %s44_s3  }
  0x92   : > { %p53_p13 = por %p52_p3, %p51_p8  ;;  %p3512_p2 = por %p4285_p0, %p57_p11 }
  0x93   : > { %p3516_p6 = por %p438_p12, %p51_p8  ;;  %p444_p5 = scmp.eq.s32.totalorder %s2466_s15, 1 }
  0x94   : > { %p2773_p7 = scmp.lt.s32.totalorder %s3214_s30, 2  ;;  %s565_s9 = sand.u32 1, %s3210_s29  }
  0x95   : > { %s4287_s12 = scalar_select %p3516_p6, 1, 0 }
  0x96   : > { %p3522_p9 = por %p444_p5, %p57_p11  ;;  %s2474_s0 = sshll.u32 %s565_s9, 6 }
  0x97   : > { %s2558_s23 = sshll.u32 %s3214_s30, 10  ;;  %s4289_s11 = sld [smem:[#allocation20_spill]] }
  0x98   : > { %s4288_s22 = scalar_select %p3522_p9, 1, 0 }
  0x99   : > { %s569_s26 = scalar_lea.vmem [#allocation3], %s2474_s0  ;;  %p3532_p4 = pnand %p2773_p7, %p53_p13 }
  0x9a   : > { %s576_s24 = sshll.u32 %s569_s26, 4  ;;  %s3538_s3 = scalar_lea.sflag [#allocation4], %s565_s9  ;;  %s3536_s24 = int_to_ptr.vmem [resolvable:$true] %s576_s24 }
  0x9b   : > { %p3108_p8 = pneg %p3532_p4 }
  0x9d   : > { %s3530_s2 = scalar_lea.hbm %s4289_s11, %s2558_s23  ;;  %s3111_s17 = scalar_lea.hbm %s4289_s11, 2048 }
  0x9e   : > { %s3106_s25 = scalar_lea.hbm %s3530_s2, 1024  ;;  %p3112_p11 = scmp.lt.u32.totalorder %s3530_s2, %s4289_s11 }
  0x9f   : > { %p3107_p10 = scmp.ne.s32.totalorder %s3530_s2, %s3106_s25  ;;  %p3113_p12 = scmp.lt.u32.totalorder %s3111_s17, %s3106_s25 }
  0xa0   : > { %p3115_p0 = scmp.lt.u32.totalorder %s3106_s25, %s3530_s2 }
  0xa1   : > { %p3109_p1 = pnand %p3108_p8, %p3107_p10  ;;  %p3114_p13 = por %p3113_p12, %p3112_p11 }
  0xa3   : > { %p3110_p3 = pneg %p3109_p1  ;;  %p3116_p5 = por %p3115_p0, %p3114_p13 }
  0xa5   : > { %p3117_p7 = pnand %p3116_p5, %p3110_p3 }
  0xa7   : > { %3120 = shalt.err (!%p3117_p7)
}
  0xa8   : > { %s3121_s9 = scalar_lea.vmem %s3536_s24, 1024  ;;  %s3225_s0 = smov [#allocation3]  }
  0xa9   : > { %p3122_p10 = scmp.ne.s32.totalorder %s3536_s24, %s3121_s9  ;;  %s3126_s23 = sshll.u32 %s3225_s0, 4  ;;  %s3127_s23 = int_to_ptr.vmem [resolvable:$false] %s3126_s23 }
  0xaa   : > { %s3128_s19 = scalar_lea.vmem %s3127_s23, 2048  ;;  %p3129_p6 = scmp.lt.s32.totalorder %s3536_s24, %s3127_s23 }
  0xab   : > { %p3124_p1 = pnand %p3122_p10, %p3108_p8  ;;  %p3130_p11 = scmp.lt.s32.totalorder %s3128_s19, %s3121_s9 }
  0xad   : > { %p3125_p9 = pneg %p3124_p1  ;;  %p3131_p12 = por %p3130_p11, %p3129_p6 }
  0xaf   : > { %p3132_p13 = pnand %p3131_p12, %p3125_p9 }
  0xb1   : > { %3135 = shalt.err (!%p3132_p13)
}
  0xb2   : > { %s4291_s25 = smov 8   ;;  %s4292_s17 = smov 128  }
  0xb3   : > { %2763 = dma.hbm_to_vmem [thread:$0]  (!%p3532_p4), %s3530_s2, 1024, %s3536_s24, %s3538_s3, %s4292_s17, %s4292_s17, %s4291_s25  }
  0xb4   : > { %p4293_p8 = scmp.ne.s32.totalorder %s4281_s20, 0 }
  0xb5   : > { %s3572_s26 = sand.u32 (!%p4293_p8), 1, %s3206_s28  }
  0xb6   : > { %588 = sbr.rel (%p4293_p8) target bundleno = 2113 (0x841), region = 92  ;;  %s2478_s9 = sshll.u32 (!%p4293_p8), %s3572_s26, 6 }
  0xb7   : > { %s591_s0 = scalar_lea.sflag (!%p4293_p8), [#allocation4], %s3572_s26  ;;  %s3578_s15 = scalar_lea.vmem (!%p4293_p8), [#allocation3], %s2478_s9 }
  0xbd   : > { %3181 = dma.done.wait (%p3512_p2), %s591_s0, 1024  }
  0xbe   : > { %3183 = vsyncadd (%p3512_p2), %s591_s0, 4294966272  ;;  %p4294_p6 = scmp.eq.s32.totalorder %s3348_s1, 0 }
  0xc0   : > { %3185 = dma.done.wait (%p4294_p6), [#allocation7], 3072   ;;  %p4295_p9 = pmov %p4294_p6 }
  0xc1   : > { %p4296_p4 = pmov %p4294_p6 }
  0xc2   : > { %3187 = vsyncadd (%p4295_p9), [#allocation7], 4294964224 }
  0xc3   : > { %3189 = dma.done.wait (%p4296_p4), [#allocation10], 2048   ;;  %p4297_p3 = pmov %p4296_p4 }
  0xc5   : > { %3191 = vsyncadd (%p4297_p3), [#allocation10], 4294965248  ;;  %p4298_p0 = pmov %p4297_p3 }
  0xc7   : > { %3193 = dma.done.wait (%p4298_p0), [#allocation13], 1024   ;;  %p4299_p5 = pmov %p4298_p0 }
  0xc8   : > { %v668_v0 = vld [vmem:[%s3578_s15] sm:$0xff]  ;;  %v670_v1 = vld [vmem:[%s3578_s15 + $0x10] sm:$0xff]  ;;  %v669_v2 = vld [vmem:[%s3578_s15 + $0x8] sm:$0xff]  ;;  %v3226_v56 = vmov 0   ;;  %s4300_s2 = sld [smem:[#allocation21_spill]]  ;;  %s4301_s23 = sld [smem:[#allocation22_spill]] }
  0xc9   : > { %3195 = vsyncadd (%p4299_p5), [#allocation13], 4294966272  ;;  %678 = vadd.xlane.f32.xlu0 %v668_v0  ;;  %682 = vadd.xlane.f32.xlu1 %v670_v1  ;;  %v671_v3 = vld [vmem:[%s3578_s15 + $0x18] sm:$0xff]  ;;  %v672_v4 = vld [vmem:[%s3578_s15 + $0x20] sm:$0xff]  ;;  %s4302_s3 = sld [smem:[#allocation24_spill]]  ;;  %s4303_s25 = sld [smem:[#allocation25_spill]] }
  0xca   : > { %v673_v5 = vld [vmem:[%s3578_s15 + $0x28] sm:$0xff]  ;;  %v674_v6 = vld [vmem:[%s3578_s15 + $0x30] sm:$0xff]  ;;  %v675_v7 = vld [vmem:[%s3578_s15 + $0x38] sm:$0xff]  ;;  %962 = vmatprep.mubr.bf16.mxu0 %v3226_v56  ;;  %2826 = vset.pattern.permute.xlu0 %v3226_v56  ;;  %s4304_s0 = sld [smem:[#allocation26_spill]]  ;;  %s666_s17 = scalar_lea.vmem [#allocation14], %s2478_s9 }
  0xcb   : > { %v2836_v8 = vld [vmem:[#allocation6 + $0x4] ss:$8 sps:$4 sm:$0xff]   ;;  %v2838_v9 = vld [vmem:[#allocation6] ss:$8 sps:$4 sm:$0xff]   ;;  %v2839_v42 = vld [vmem:[#allocation6 + $0x14] ss:$8 sps:$4 sm:$0xff]   ;;  %2827 = vset.pattern.permute.xlu1 %v3226_v56 }
  0xcc   : > { %930 = vmatprep.subr.bf16.mxu0 %v2836_v8  ;;  %v2841_v43 = vld [vmem:[#allocation6 + $0x10] ss:$8 sps:$4 sm:$0xff]   ;;  %v2842_v44 = vld [vmem:[#allocation6 + $0x24] ss:$8 sps:$4 sm:$0xff]   ;;  %v2844_v45 = vld [vmem:[#allocation6 + $0x20] ss:$8 sps:$4 sm:$0xff]  }
  0xcd   : > { %680 = vadd.xlane.f32.xlu0 %v669_v2  ;;  %684 = vadd.xlane.f32.xlu1 %v671_v3  ;;  %v2845_v46 = vld [vmem:[#allocation6 + $0x34] ss:$8 sps:$4 sm:$0xff]   ;;  %v2847_v47 = vld [vmem:[#allocation6 + $0x30] ss:$8 sps:$4 sm:$0xff]   ;;  %v2848_v48 = vld [vmem:[#allocation6 + $0x44] ss:$8 sps:$4 sm:$0xff]  }
  0xce   : > { %931 = vmatpush1.bf16.msra.mxu0 %v2838_v9  ;;  %v2850_v49 = vld [vmem:[#allocation6 + $0x40] ss:$8 sps:$4 sm:$0xff]   ;;  %v2851_v50 = vld [vmem:[#allocation6 + $0x54] ss:$8 sps:$4 sm:$0xff]   ;;  %v2853_v51 = vld [vmem:[#allocation6 + $0x50] ss:$8 sps:$4 sm:$0xff]  }
  0xcf   : > { %932 = vmatprep.subr.bf16.mxu0 %v2839_v42  ;;  %v2854_v52 = vld [vmem:[#allocation6 + $0x64] ss:$8 sps:$4 sm:$0xff]   ;;  %v2856_v53 = vld [vmem:[#allocation6 + $0x60] ss:$8 sps:$4 sm:$0xff]   ;;  %v2857_v54 = vld [vmem:[#allocation6 + $0x74] ss:$8 sps:$4 sm:$0xff]  }
  0xd0   : > { %v2859_v55 = vld [vmem:[#allocation6 + $0x70] ss:$8 sps:$4 sm:$0xff]   ;;  %s2559_s20 = sshll.u32 %s3348_s1, 10  ;;  %s2332_s24 = scalar_lea.sflag [#allocation5], %s3572_s26 }
  0xd1   : > { %686 = vadd.xlane.f32.xlu0 %v672_v4  ;;  %688 = vadd.xlane.f32.xlu1 %v673_v5  ;;  %p4309_p7 = scmp.ne.s32.totalorder %s4287_s12, 0 }
  0xd2   : > { %933 = vmatpush1.bf16.msra.mxu0 %v2841_v43 }
  0xd3   : > { %934 = vmatprep.subr.bf16.mxu0 %v2842_v44 }
  0xd5   : > { %690 = vadd.xlane.f32.xlu0 %v674_v6  ;;  %692 = vadd.xlane.f32.xlu1 %v675_v7 }
  0xd6   : > { %935 = vmatpush1.bf16.msra.mxu0 %v2844_v45 }
  0xd7   : > { %936 = vmatprep.subr.bf16.mxu0 %v2845_v46 }
  0xda   : > { %937 = vmatpush1.bf16.msra.mxu0 %v2847_v47 }
  0xdb   : > { %938 = vmatprep.subr.bf16.mxu0 %v2848_v48 }
  0xde   : > { %939 = vmatpush1.bf16.msra.mxu0 %v2850_v49 }
  0xdf   : > { %940 = vmatprep.subr.bf16.mxu0 %v2851_v50 }
  0xe2   : > { %941 = vmatpush1.bf16.msra.mxu0 %v2853_v51 }
  0xe3   : > { %942 = vmatprep.subr.bf16.mxu0 %v2854_v52  ;;  %v2486_v52 = vld [vmem:[%s4301_s23] ss:$0 sm:$0xff]  ;;  %s4306_s23 = sld [smem:[#allocation28_spill]] }
  0xe6   : > { %943 = vmatpush1.bf16.msra.mxu0 %v2856_v53 }
  0xe7   : > { %944 = vmatprep.subr.bf16.mxu0 %v2857_v54 }
  0xea   : > { %945 = vmatpush1.bf16.msra.mxu0 %v2859_v55  ;;  %v3689_v55 = vld [vmem:[%s4249_s5] ss:$0 sm:$0xff] }
 0x156   : > { %v679_v10 = vpop.xlane.xlu0 %678  ;;  %v683_v11 = vpop.xlane.xlu1 %682 }
 0x157   : > { %v3604_v12 = vmul.f32 0.03125, %v679_v10  ;;  %v3606_v13 = vmul.f32 0.03125, %v683_v11 }
 0x159   : > { %v3609_v14 = vsub.f32 %v668_v0, %v3604_v12  ;;  %v3612_v15 = vsub.f32 %v670_v1, %v3606_v13  ;;  %v734_v57 = vmul.f32 96.0, %v3604_v12  ;;  %v736_v60 = vmul.f32 96.0, %v3606_v13 }
 0x15a   : > { %v681_v16 = vpop.xlane.xlu0 %680  ;;  %v685_v17 = vpop.xlane.xlu1 %684 }
 0x15b   : > { %v3614_v18 = vmul.f32 0.03125, %v681_v16  ;;  %v710_v19 = vmul.f32 %v3609_v14, %v3609_v14  ;;  %v3618_v20 = vmul.f32 0.03125, %v685_v17  ;;  %v712_v21 = vmul.f32 %v3612_v15, %v3612_v15 }
 0x15c   : > { %v742_v58 = vmul.f32 %v734_v57, %v3604_v12 }
 0x15d   : > { %718 = vadd.xlane.f32.xlu0 %v710_v19  ;;  %v3623_v22 = vsub.f32 %v669_v2, %v3614_v18  ;;  %v3626_v23 = vsub.f32 %v671_v3, %v3618_v20  ;;  %v735_v59 = vmul.f32 96.0, %v3614_v18  ;;  %v737_v63 = vmul.f32 96.0, %v3618_v20 }
 0x15e   : > { %v687_v24 = vpop.xlane.xlu0 %686  ;;  %v689_v25 = vpop.xlane.xlu1 %688  ;;  %v744_v3 = vmul.f32 %v736_v60, %v3606_v13 }
 0x15f   : > { %v3628_v26 = vmul.f32 0.03125, %v687_v24  ;;  %v711_v27 = vmul.f32 %v3623_v22, %v3623_v22  ;;  %v3632_v28 = vmul.f32 0.03125, %v689_v25  ;;  %v713_v29 = vmul.f32 %v3626_v23, %v3626_v23 }
 0x160   : > { %v743_v2 = vmul.f32 %v735_v59, %v3614_v18  ;;  %v745_v9 = vmul.f32 %v737_v63, %v3618_v20 }
 0x161   : > { %722 = vadd.xlane.f32.xlu0 %v712_v21  ;;  %720 = vadd.xlane.f32.xlu1 %v711_v27  ;;  %v3637_v30 = vsub.f32 %v672_v4, %v3628_v26  ;;  %v3640_v31 = vsub.f32 %v673_v5, %v3632_v28  ;;  %v738_v0 = vmul.f32 96.0, %v3628_v26  ;;  %v739_v11 = vmul.f32 96.0, %v3632_v28 }
 0x162   : > { %v691_v32 = vpop.xlane.xlu0 %690  ;;  %v693_v33 = vpop.xlane.xlu1 %692 }
 0x163   : > { %v3642_v34 = vmul.f32 0.03125, %v691_v32  ;;  %v714_v35 = vmul.f32 %v3637_v30, %v3637_v30  ;;  %v3646_v36 = vmul.f32 0.03125, %v693_v33  ;;  %v715_v37 = vmul.f32 %v3640_v31, %v3640_v31 }
 0x164   : > { %v746_v10 = vmul.f32 %v738_v0, %v3628_v26  ;;  %v747_v27 = vmul.f32 %v739_v11, %v3632_v28 }
 0x165   : > { %724 = vadd.xlane.f32.xlu1 %v713_v29  ;;  %726 = vadd.xlane.f32.xlu0 %v714_v35  ;;  %v3651_v38 = vsub.f32 %v674_v6, %v3642_v34  ;;  %v3654_v39 = vsub.f32 %v675_v7, %v3646_v36  ;;  %v740_v17 = vmul.f32 96.0, %v3642_v34  ;;  %v741_v29 = vmul.f32 96.0, %v3646_v36 }
 0x167   : > { %v716_v40 = vmul.f32 %v3651_v38, %v3651_v38  ;;  %v717_v41 = vmul.f32 %v3654_v39, %v3654_v39  ;;  %v748_v32 = vmul.f32 %v740_v17, %v3642_v34  ;;  %v749_v45 = vmul.f32 %v741_v29, %v3646_v36  ;;  %v2485_v34 = vld [vmem:[%s4300_s2] ss:$0 sm:$0xff]  ;;  %s4305_s2 = sld [smem:[#allocation27_spill]] }
 0x169   : > { %728 = vadd.xlane.f32.xlu1 %v715_v37  ;;  %730 = vadd.xlane.f32.xlu0 %v716_v40 }
 0x16d   : > { %732 = vadd.xlane.f32.xlu1 %v717_v41 }
 0x1ea   : > { %v719_v61 = vpop.xlane.xlu0 %718 }
 0x1eb   : > { %v750_v62 = vsub.f32 %v719_v61, %v742_v58 }
 0x1ed   : > { %v758_v1 = vmul.f32 0.03125, %v750_v62  ;;  %v3697_v62 = vld [vmem:[%s4249_s5 + $0x1] ss:$0 sm:$0xff] }
 0x1ee   : > { %v721_v4 = vpop.xlane.xlu1 %720  ;;  %v723_v5 = vpop.xlane.xlu0 %722 }
 0x1ef   : > { %v766_v6 = vadd.f32 1e-05, %v758_v1  ;;  %v751_v7 = vsub.f32 %v721_v4, %v743_v2  ;;  %v752_v8 = vsub.f32 %v723_v5, %v744_v3 }
 0x1f1   : > { %2892 = vrsqrt.f32 %v766_v6  ;;  %v759_v12 = vmul.f32 0.03125, %v751_v7  ;;  %v760_v16 = vmul.f32 0.03125, %v752_v8 }
 0x1f2   : > { %v725_v19 = vpop.xlane.xlu1 %724  ;;  %v727_v18 = vpop.xlane.xlu0 %726 }
 0x1f3   : > { %v767_v21 = vadd.f32 1e-05, %v759_v12  ;;  %v768_v13 = vadd.f32 1e-05, %v760_v16  ;;  %v753_v24 = vsub.f32 %v725_v19, %v745_v9  ;;  %v754_v25 = vsub.f32 %v727_v18, %v746_v10 }
 0x1f5   : > { %2894 = vrsqrt.f32 %v767_v21  ;;  %v761_v20 = vmul.f32 0.03125, %v753_v24  ;;  %v762_v26 = vmul.f32 0.03125, %v754_v25 }
 0x1f6   : > { %2896 = vrsqrt.f32 %v768_v13  ;;  %v729_v33 = vpop.xlane.xlu1 %728  ;;  %v731_v35 = vpop.xlane.xlu0 %730 }
 0x1f7   : > { %v769_v37 = vadd.f32 1e-05, %v761_v20  ;;  %v770_v40 = vadd.f32 1e-05, %v762_v26  ;;  %v755_v41 = vsub.f32 %v729_v33, %v747_v27  ;;  %v756_v42 = vsub.f32 %v731_v35, %v748_v32 }
 0x1f9   : > { %2898 = vrsqrt.f32 %v769_v37  ;;  %v763_v43 = vmul.f32 0.03125, %v755_v41  ;;  %v764_v44 = vmul.f32 0.03125, %v756_v42 }
 0x1fa   : > { %2900 = vrsqrt.f32 %v770_v40  ;;  %v733_v28 = vpop.xlane.xlu1 %732 }
 0x1fb   : > { %v2893_v46 = vpop.eup %2892  ;;  %v771_v47 = vadd.f32 1e-05, %v763_v43  ;;  %v772_v48 = vadd.f32 1e-05, %v764_v44  ;;  %v757_v49 = vsub.f32 %v733_v28, %v749_v45  ;;  %v840_v45 = vlaneseq }
 0x1fc   : > { %v782_v50 = vmul.f32 %v2893_v46, %v3609_v14  ;;  %v3727_v46 = vld [vmem:[%s4248_s4] sm:$0x3] }
 0x1fd   : > { %2902 = vrsqrt.f32 %v771_v47  ;;  %v765_v51 = vmul.f32 0.03125, %v757_v49  ;;  %v3722_v28 = vshrl.u32 %v840_v45, 7  ;;  %v3227_v49 = vmov 0.0  }
 0x1fe   : > { %2904 = vrsqrt.f32 %v772_v48  ;;  %v796_v36 = vmul.f32 %v2485_v34, %v782_v50  ;;  %1084 = vst [vmem:[#allocation2 + $0x7] sm:$0xff] %v3227_v49  ;;  %1090 = vst [vmem:[#allocation2 + $0x1f] sm:$0x1] %v3227_v49 }
 0x1ff   : > { %v2895_v53 = vpop.eup %2894  ;;  %v773_v54 = vadd.f32 1e-05, %v765_v51  ;;  %v842_v47 = vsub.s32 0, %v3722_v28  ;;  %1098 = vst [vmem:[#allocation2 + $0x28] sm:$0x1] %v3227_v49  ;;  %1087 = vst [vmem:[#allocation2 + $0xdf] sm:$0xff] %v3227_v49 }
 0x200   : > { %v2897_v57 = vpop.eup %2896  ;;  %v810_v58 = vadd.f32 %v2486_v52, %v796_v36  ;;  %v783_v59 = vmul.f32 %v2895_v53, %v3623_v22  ;;  %1085 = vst [vmem:[#allocation2 + $0xf] sm:$0x3] %v3227_v49  ;;  %1088 = vst [vmem:[#allocation2 + $0xe7] sm:$0x3] %v3227_v49 }
 0x201   : > { %2906 = vrsqrt.f32 %v773_v54  ;;  %v784_v14 = vmul.f32 %v2897_v57, %v3612_v15  ;;  %v3731_v48 = vrot.slane %v3727_v46, %v842_v47  ;;  %1091 = vst [vmem:[#allocation2 + $0x37] sm:$0x1] %v3227_v49  ;;  %1092 = vst [vmem:[#allocation2 + $0x4f] sm:$0x1] %v3227_v49  ;;  %v3771_v47 = vld [vmem:[%s4251_s7 + $0x6] ss:$0 sm:$0xff] }
 0x202   : > { %v1008_v60 = vmul.f32 %v3689_v55, %v810_v58  ;;  %v797_v61 = vmul.f32 %v2485_v34, %v783_v59  ;;  %v1052_v22 = vmul.f32 %v3697_v62, %v810_v58  ;;  %1093 = vst [vmem:[#allocation2 + $0x67] sm:$0x1] %v3227_v49  ;;  %1094 = vst [vmem:[#allocation2 + $0x7f] sm:$0x1] %v3227_v49 }
 0x203   : > { %v2899_v63 = vpop.eup %2898  ;;  %v798_v0 = vmul.f32 %v2485_v34, %v784_v14  ;;  %1095 = vst [vmem:[#allocation2 + $0x97] sm:$0x1] %v3227_v49  ;;  %1096 = vst [vmem:[#allocation2 + $0xaf] sm:$0x1] %v3227_v49 }
 0x204   : > { %v2901_v1 = vpop.eup %2900  ;;  %1016 = vadd.xlane.f32.xlu0 %v1008_v60  ;;  %v811_v2 = vadd.f32 %v2486_v52, %v797_v61  ;;  %v785_v3 = vmul.f32 %v2899_v63, %v3626_v23  ;;  %1097 = vst [vmem:[#allocation2 + $0xc7] sm:$0x1] %v3227_v49  ;;  %1099 = vst [vmem:[#allocation2 + $0x40] sm:$0x1] %v3227_v49 }
 0x205   : > { %v786_v4 = vmul.f32 %v2901_v1, %v3637_v30  ;;  %v812_v6 = vadd.f32 %v2486_v52, %v798_v0  ;;  %1100 = vst [vmem:[#allocation2 + $0x58] sm:$0x1] %v3227_v49  ;;  %1101 = vst [vmem:[#allocation2 + $0x70] sm:$0x1] %v3227_v49 }
 0x206   : > { %v1009_v15 = vmul.f32 %v3689_v55, %v811_v2  ;;  %v818_v5 = vpack.c.bf16 %v811_v2, %v810_v58  ;;  %v799_v7 = vmul.f32 %v2485_v34, %v785_v3  ;;  %v1053_v16 = vmul.f32 %v3697_v62, %v811_v2  ;;  %1102 = vst [vmem:[#allocation2 + $0x88] sm:$0x1] %v3227_v49 }
 0x207   : > { %v2903_v8 = vpop.eup %2902  ;;  %v800_v9 = vmul.f32 %v2485_v34, %v786_v4  ;;  %v1010_v30 = vmul.f32 %v3689_v55, %v812_v6  ;;  %1103 = vst [vmem:[#allocation2 + $0xa0] sm:$0x1] %v3227_v49  ;;  %1104 = vst [vmem:[#allocation2 + $0xb8] sm:$0x1] %v3227_v49  ;;  %v3228_v58 = vmov 1  }
 0x208   : > { %v2905_v10 = vpop.eup %2904  ;;  %1018 = vadd.xlane.f32.xlu1 %v1009_v15  ;;  %1060 = vadd.xlane.f32.xlu0 %v1052_v22  ;;  %v813_v11 = vadd.f32 %v2486_v52, %v799_v7  ;;  %v787_v12 = vmul.f32 %v2903_v8, %v3640_v31  ;;  %1105 = vst [vmem:[#allocation2 + $0xd0] sm:$0x1] %v3227_v49  ;;  %v1179_v49 = vld [vmem:[#allocation2 + $0x8] sm:$0xff] }
 0x209   : > { %963 = vmatmul.mubr.bf16.vlgmr.msra.gmra.mrb[0].mxu0 %v818_v5  ;;  %v788_v23 = vmul.f32 %v2905_v10, %v3651_v38  ;;  %v814_v21 = vadd.f32 %v2486_v52, %v800_v9  ;;  %v1054_v38 = vmul.f32 %v3697_v62, %v812_v6 }
 0x20a   : > { %972 = vmatprep.mubr.bf16.mxu0 %v3226_v56  ;;  %v819_v17 = vpack.c.bf16 %v813_v11, %v812_v6  ;;  %v801_v19 = vmul.f32 %v2485_v34, %v787_v12  ;;  %v1011_v31 = vmul.f32 %v3689_v55, %v813_v11  ;;  %v1055_v32 = vmul.f32 %v3697_v62, %v813_v11 }
 0x20b   : > { %v2907_v18 = vpop.eup %2906  ;;  %v802_v24 = vmul.f32 %v2485_v34, %v788_v23  ;;  %v1012_v33 = vmul.f32 %v3689_v55, %v814_v21  ;;  %v1056_v37 = vmul.f32 %v3697_v62, %v814_v21 }
 0x20c   : > { %1062 = vadd.xlane.f32.xlu1 %v1053_v16  ;;  %1020 = vadd.xlane.f32.xlu0 %v1010_v30  ;;  %v815_v13 = vadd.f32 %v2486_v52, %v801_v19  ;;  %v789_v25 = vmul.f32 %v2907_v18, %v3654_v39  ;;  %v2860_v30 = vld [vmem:[#allocation8] sm:$0xff]   ;;  %v2861_v19 = vld [vmem:[#allocation8 + $0x8] sm:$0xff]   ;;  %v2862_v18 = vld [vmem:[#allocation8 + $0x10] sm:$0xff]  }
 0x20d   : > { %v816_v20 = vadd.f32 %v2486_v52, %v802_v24  ;;  %2608 = vmatprep.subr.bf16.mxu1 %v2860_v30 }
 0x20e   : > { %v820_v27 = vpack.c.bf16 %v815_v13, %v814_v21  ;;  %v803_v29 = vmul.f32 %v2485_v34, %v789_v25  ;;  %v1013_v39 = vmul.f32 %v3689_v55, %v815_v13  ;;  %v1057_v40 = vmul.f32 %v3697_v62, %v815_v13  ;;  %v2504_v34 = vld [vmem:[%s4250_s6] ss:$0 sm:$0xff]  ;;  %2609 = vmatpush3.bf16.msra.mxu1 %v2860_v30  ;;  %v2863_v21 = vld [vmem:[#allocation8 + $0x18] sm:$0xff]   ;;  %v2864_v13 = vld [vmem:[#allocation8 + $0x20] sm:$0xff]  }
 0x20f   : > { %v1014_v41 = vmul.f32 %v3689_v55, %v816_v20  ;;  %v1058_v43 = vmul.f32 %v3697_v62, %v816_v20  ;;  %2610 = vmatprep.subr.bf16.mxu1 %v2861_v19  ;;  %v2865_v25 = vld [vmem:[#allocation8 + $0x28] sm:$0xff]  }
 0x210   : > { %1022 = vadd.xlane.f32.xlu1 %v1011_v31  ;;  %1064 = vadd.xlane.f32.xlu0 %v1054_v38  ;;  %v817_v26 = vadd.f32 %v2486_v52, %v803_v29  ;;  %v2866_v29 = vld [vmem:[#allocation8 + $0x30] sm:$0xff]  }
 0x211   : > { %973 = vmatmul.mubr.bf16.gmra.mrb[4].mxu0 %v819_v17 }
 0x212   : > { %982 = vmatprep.mubr.bf16.mxu0 %v3226_v56  ;;  %v821_v35 = vpack.c.bf16 %v817_v26, %v816_v20  ;;  %v1015_v42 = vmul.f32 %v3689_v55, %v817_v26  ;;  %v1059_v44 = vmul.f32 %v3697_v62, %v817_v26  ;;  %2611 = vmatpush3.bf16.msra.mxu1 %v2861_v19 }
 0x213   : > { %2612 = vmatprep.subr.bf16.mxu1 %v2862_v18 }
 0x214   : > { %1066 = vadd.xlane.f32.xlu1 %v1055_v32  ;;  %1024 = vadd.xlane.f32.xlu0 %v1012_v33  ;;  %v2867_v32 = vld [vmem:[#allocation8 + $0x38] sm:$0xff]  }
 0x216   : > { %2613 = vmatpush3.bf16.msra.mxu1 %v2862_v18 }
 0x217   : > { %2614 = vmatprep.subr.bf16.mxu1 %v2863_v21 }
 0x218   : > { %1026 = vadd.xlane.f32.xlu1 %v1013_v39  ;;  %1068 = vadd.xlane.f32.xlu0 %v1056_v37  ;;  %v3754_v37 = vld [vmem:[%s4251_s7] ss:$0 sm:$0xff] }
 0x219   : > { %983 = vmatmul.mubr.bf16.gmra.mrb[8].mxu0 %v820_v27 }
 0x21a   : > { %992 = vmatprep.mubr.bf16.mxu0 %v3226_v56  ;;  %2615 = vmatpush3.bf16.msra.mxu1 %v2863_v21 }
 0x21b   : > { %2616 = vmatprep.subr.bf16.mxu1 %v2864_v13 }
 0x21c   : > { %1070 = vadd.xlane.f32.xlu1 %v1057_v40  ;;  %1028 = vadd.xlane.f32.xlu0 %v1014_v41  ;;  %v3759_v41 = vld [vmem:[%s4251_s7 + $0x3] ss:$0 sm:$0xff] }
 0x21e   : > { %2617 = vmatpush3.bf16.msra.mxu1 %v2864_v13 }
 0x21f   : > { %2618 = vmatprep.subr.bf16.mxu1 %v2865_v25 }
 0x220   : > { %1030 = vadd.xlane.f32.xlu1 %v1015_v42  ;;  %1072 = vadd.xlane.f32.xlu0 %v1058_v43 }
 0x221   : > { %993 = vmatmul.mubr.bf16.gmra.mrb[12].mxu0 %v821_v35 }
 0x222   : > { %2619 = vmatpush3.bf16.msra.mxu1 %v2865_v25 }
 0x223   : > { %2620 = vmatprep.subr.bf16.mxu1 %v2866_v29 }
 0x224   : > { %1074 = vadd.xlane.f32.xlu1 %v1059_v44  ;;  %v1129_v44 = vmul.f32 0.0, %v3754_v37 }
 0x226   : > { %2621 = vmatpush3.bf16.msra.mxu1 %v2866_v29 }
 0x227   : > { %2622 = vmatprep.subr.bf16.mxu1 %v2867_v32 }
 0x22a   : > { %2623 = vmatpush3.bf16.msra.mxu1 %v2867_v32 }
 0x291   : > { %v1017_v50 = vpop.xlane.xlu0 %1016 }
 0x292   : > { %v1039_v51 = vadd.f32 %v2504_v34, %v1017_v50 }
 0x294   : > { %1423 = vperm.xlu0 %2826, %v1039_v51  }
 0x295   : > { %v1019_v52 = vpop.xlane.xlu1 %1018  ;;  %v1061_v36 = vpop.xlane.xlu0 %1060 }
 0x296   : > { %v1040_v53 = vadd.f32 %v2504_v34, %v1019_v52  ;;  %v1076_v57 = vadd.f32 %v2504_v34, %v1061_v36  ;;  %v3780_v52 = vld [vmem:[%s4251_s7 + $0x1] ss:$0 sm:$0xff]  ;;  %v3785_v36 = vld [vmem:[%s4251_s7 + $0x4] ss:$0 sm:$0xff] }
 0x298   : > { %1428 = vperm.xlu1 %2827, %v1040_v53   ;;  %v1252_v53 = vld [vmem:[#allocation2 + $0x9] sm:$0xff] }
 0x299   : > { %v1063_v54 = vpop.xlane.xlu1 %1062  ;;  %v1021_v55 = vpop.xlane.xlu0 %1020 }
 0x29a   : > { %v1077_v60 = vadd.f32 %v2504_v34, %v1063_v54  ;;  %v1041_v63 = vadd.f32 %v2504_v34, %v1021_v55 }
 0x29c   : > { %2828 = vset.pattern.permute.xlu1 %v3228_v58 }
 0x29d   : > { %v1023_v59 = vpop.xlane.xlu1 %1022  ;;  %1471 = vperm.xlu1 %2828, %v1076_v57   ;;  %v1065_v14 = vpop.xlane.xlu0 %1064  ;;  %v1188_v57 = vld [vmem:[#allocation2 + $0xe0] sm:$0xff] }
 0x29e   : > { %v1042_v3 = vadd.f32 %v2504_v34, %v1023_v59  ;;  %v1078_v5 = vadd.f32 %v2504_v34, %v1065_v14  ;;  %v3794_v14 = vld [vmem:[%s4251_s7 + $0x2] ss:$0 sm:$0xff] }
 0x2a1   : > { %v1067_v61 = vpop.xlane.xlu1 %1066  ;;  %1476 = vperm.xlu1 %2828, %v1077_v60   ;;  %v1025_v62 = vpop.xlane.xlu0 %1024 }
 0x2a2   : > { %v1079_v8 = vadd.f32 %v2504_v34, %v1067_v61  ;;  %v1043_v9 = vadd.f32 %v2504_v34, %v1025_v62  ;;  %v1194_v61 = vmul.f32 %v3780_v52, %v1179_v49  ;;  %v1261_v62 = vld [vmem:[#allocation2 + $0xe1] sm:$0xff] }
 0x2a5   : > { %v1027_v0 = vpop.xlane.xlu1 %1026  ;;  %2829 = vset.pattern.permute.xlu1 %v3226_v56  ;;  %v1069_v1 = vpop.xlane.xlu0 %1068 }
 0x2a6   : > { %v1044_v2 = vadd.f32 %v2504_v34, %v1027_v0  ;;  %1433 = vperm.xlu1 %2829, %v1041_v63   ;;  %v1080_v10 = vadd.f32 %v2504_v34, %v1069_v1  ;;  %v2869_v63 = vld [vmem:[#allocation9 + $0x8] sm:$0xff]   ;;  %v3801_v0 = vld [vmem:[%s4251_s7 + $0x7] ss:$0 sm:$0xff]  ;;  %v3804_v1 = vmul.f32 %v3794_v14, %v1252_v53 }
 0x2a8   : > { %1448 = vperm.xlu0 %2826, %v1044_v2  }
 0x2a9   : > { %v1071_v22 = vpop.xlane.xlu1 %1070  ;;  %v1029_v4 = vpop.xlane.xlu0 %1028 }
 0x2aa   : > { %v1081_v15 = vadd.f32 %v2504_v34, %v1071_v22  ;;  %1438 = vperm.xlu1 %2829, %v1042_v3   ;;  %v1045_v11 = vadd.f32 %v2504_v34, %v1029_v4  ;;  %v3811_v22 = vld [vmem:[%s4251_s7 + $0x8] ss:$0 sm:$0xff] }
 0x2ac   : > { %2833 = vset.pattern.permute.xlu0 %v3228_v58 }
 0x2ad   : > { %1496 = vperm.xlu0 %2833, %v1081_v15   ;;  %v1073_v6 = vpop.xlane.xlu0 %1072  ;;  %v1031_v12 = vpop.xlane.xlu1 %1030  ;;  %v3814_v15 = vmul.f32 0.0, %v3771_v47 }
 0x2ae   : > { %v1082_v7 = vadd.f32 %v2504_v34, %v1073_v6  ;;  %2830 = vset.pattern.permute.xlu1 %v3228_v58  ;;  %v1046_v23 = vadd.f32 %v2504_v34, %v1031_v12 }
 0x2af   : > { %1481 = vperm.xlu1 %2830, %v1078_v5   ;;  %v3817_v5 = vmul.f32 %v3801_v0, %v1188_v57 }
 0x2b1   : > { %1501 = vperm.xlu0 %2833, %v1082_v7   ;;  %v1075_v16 = vpop.xlane.xlu1 %1074 }
 0x2b2   : > { %v1083_v17 = vadd.f32 %v2504_v34, %v1075_v16  ;;  %v3831_v16 = vld [vmem:[%s4251_s7 + $0x5] ss:$0 sm:$0xff] }
 0x2b3   : > { %1486 = vperm.xlu1 %2830, %v1079_v8  }
 0x2b7   : > { %2831 = vset.pattern.permute.xlu1 %v3226_v56 }
 0x2b8   : > { %1443 = vperm.xlu1 %2831, %v1043_v9  }
 0x2bc   : > { %2832 = vset.pattern.permute.xlu1 %v3228_v58 }
 0x2bd   : > { %1491 = vperm.xlu1 %2832, %v1080_v10   ;;  %v3825_v10 = vmul.f32 %v3811_v22, %v1261_v62 }
 0x2c1   : > { %2834 = vset.pattern.permute.xlu1 %v3226_v56  ;;  %v846_v56 = vsub.s32 1, %v3722_v28 }
 0x2c2   : > { %1453 = vperm.xlu1 %2834, %v1045_v11   ;;  %v2870_v11 = vld [vmem:[#allocation9 + $0x10] sm:$0xff]  }
 0x2c3   : > { %v3741_v24 = vrot.slane %v3727_v46, %v846_v56 }
 0x2c6   : > { %1458 = vperm.xlu1 %2834, %v1046_v23  }
 0x2ca   : > { %2835 = vset.pattern.permute.xlu1 %v3228_v58  ;;  %v2868_v58 = vld [vmem:[#allocation9] sm:$0xff]  }
 0x2cb   : > { %1506 = vperm.xlu1 %2835, %v1083_v17   ;;  %2632 = vmatprep.subr.bf16.mxu0 %v2868_v58 }
 0x2cc   : > { %2633 = vmatpush3.bf16.msra.mxu0 %v2868_v58 }
 0x2cd   : > { %2634 = vmatprep.subr.bf16.mxu0 %v2869_v63 }
 0x2d0   : > { %2635 = vmatpush3.bf16.msra.mxu0 %v2869_v63 }
 0x2d1   : > { %2636 = vmatprep.subr.bf16.mxu0 %v2870_v11 }
 0x2d4   : > { %2637 = vmatpush3.bf16.msra.mxu0 %v2870_v11 }
 0x2dc   : > { %v964_v31 = vpop.f32.mrb[0].mxu0 }
 0x2dd   : > { %v3744_v38 = vadd.f32 %v964_v31, %v3731_v48  ;;  %v966_v27 = vpop.f32.mrb[1].mxu0 }
 0x2de   : > { %v967_v20 = vadd.f32 %v966_v27, %v3741_v24  ;;  %v968_v26 = vpop.f32.mrb[2].mxu0 }
 0x2df   : > { %v3748_v33 = vadd.f32 %v968_v26, %v3731_v48  ;;  %v970_v35 = vpop.f32.mrb[3].mxu0 }
 0x2e0   : > { %1106 = vst [vmem:[#allocation2 + $0x20] sm:$0xff] %v967_v20  ;;  %v971_v39 = vadd.f32 %v970_v35, %v3741_v24  ;;  %v1195_v6 = vmul.f32 %v3780_v52, %v967_v20  ;;  %v1215_v7 = vmul.f32 %v3785_v36, %v967_v20 }
 0x2e2   : > { %1107 = vst [vmem:[#allocation2 + $0x38] sm:$0xff] %v971_v39  ;;  %v1196_v30 = vmul.f32 %v3780_v52, %v971_v39  ;;  %v1216_v56 = vmul.f32 %v3785_v36, %v971_v39  ;;  %v1236_v13 = vmul.f32 %v3801_v0, %v971_v39 }
 0x2e4   : > { %v974_v40 = vpop.f32.mrb[4].mxu0 }
 0x2e5   : > { %v3762_v42 = vadd.f32 %v974_v40, %v3731_v48  ;;  %v976_v43 = vpop.f32.mrb[5].mxu0 }
 0x2e6   : > { %v3766_v45 = vadd.f32 %v976_v43, %v3741_v24  ;;  %v978_v28 = vpop.f32.mrb[6].mxu0 }
 0x2e7   : > { %v1115_v46 = vld [vmem:[#allocation2 + $0x1f] sm:$0xff]  ;;  %v3774_v34 = vadd.f32 %v978_v28, %v3731_v48  ;;  %v980_v50 = vpop.f32.mrb[7].mxu0  ;;  %v2871_v28 = vld [vmem:[#allocation9 + $0x18] sm:$0xff]  }
 0x2e8   : > { %v1142_v51 = vmul.f32 %v3759_v41, %v1115_v46  ;;  %1108 = vst [vmem:[#allocation2 + $0x50] sm:$0xff] %v3766_v45  ;;  %v3789_v55 = vadd.f32 %v980_v50, %v3741_v24  ;;  %v1130_v12 = vmul.f32 %v3754_v37, %v1115_v46  ;;  %v1253_v23 = vld [vmem:[#allocation2 + $0x21] sm:$0xff]  ;;  %v1197_v43 = vmul.f32 %v3780_v52, %v3766_v45 }
 0x2e9   : > { %v1116_v54 = vld [vmem:[#allocation2 + $0x37] sm:$0xff]  ;;  %v3847_v40 = vmul.f32 %v3794_v14, %v1253_v23  ;;  %v1288_v39 = vmul.f32 %v3831_v16, %v1253_v23  ;;  %2638 = vmatprep.subr.bf16.mxu0 %v2871_v28 }
 0x2ea   : > { %v1150_v59 = vadd.f32 %v1142_v51, %v1129_v44  ;;  %v1163_v60 = vmul.f32 %v3771_v47, %v1116_v54  ;;  %1109 = vst [vmem:[#allocation2 + $0x68] sm:$0xff] %v3789_v55  ;;  %v1143_v2 = vmul.f32 %v3759_v41, %v1116_v54  ;;  %v1131_v21 = vmul.f32 %v3754_v37, %v1116_v54  ;;  %v1254_v26 = vld [vmem:[#allocation2 + $0x39] sm:$0xff] }
 0x2eb   : > { %v1217_v44 = vmul.f32 %v3785_v36, %v3766_v45  ;;  %v1237_v51 = vmul.f32 %v3801_v0, %v3766_v45  ;;  %v3857_v54 = vmul.f32 %v3794_v14, %v1254_v26  ;;  %v3860_v57 = vmul.f32 %v3831_v16, %v1254_v26  ;;  %2639 = vmatpush3.bf16.msra.mxu0 %v2871_v28 }
 0x2ec   : > { %v1171_v3 = vadd.f32 %v1163_v60, %v1150_v59  ;;  %v984_v4 = vpop.f32.mrb[8].mxu0  ;;  %v1151_v29 = vadd.f32 %v1143_v2, %v1130_v12  ;;  %v3863_v58 = vmul.f32 %v3811_v22, %v1254_v26  ;;  %v3869_v63 = vmul.f32 %v3780_v52, %v3789_v55  ;;  %v2872_v12 = vld [vmem:[#allocation9 + $0x20] sm:$0xff]  }
 0x2ed   : > { %v3822_v8 = vadd.f32 %v984_v4, %v3731_v48  ;;  %v986_v9 = vpop.f32.mrb[9].mxu0  ;;  %v1218_v45 = vmul.f32 %v3785_v36, %v3789_v55  ;;  %2640 = vmatprep.subr.bf16.mxu0 %v2872_v12 }
 0x2ee   : > { %v1202_v17 = vadd.f32 %v1194_v61, %v1171_v3  ;;  %v3835_v19 = vadd.f32 %v986_v9, %v3741_v24  ;;  %v988_v18 = vpop.f32.mrb[10].mxu0 }
 0x2ef   : > { %v1117_v25 = vld [vmem:[#allocation2 + $0x4f] sm:$0xff]  ;;  %v3841_v31 = vadd.f32 %v988_v18, %v3731_v48  ;;  %v990_v27 = vpop.f32.mrb[11].mxu0  ;;  %2641 = vmatpush3.bf16.msra.mxu0 %v2872_v12 }
 0x2f0   : > { %v1223_v20 = vadd.f32 %v1215_v7, %v1202_v17  ;;  %v1144_v32 = vmul.f32 %v3759_v41, %v1117_v25  ;;  %v1164_v35 = vmul.f32 %v3771_v47, %v1117_v25  ;;  %1110 = vst [vmem:[#allocation2 + $0x80] sm:$0xff] %v3835_v19  ;;  %v1255_v59 = vld [vmem:[#allocation2 + $0x51] sm:$0xff]  ;;  %v1132_v3 = vmul.f32 %v3754_v37, %v1117_v25 }
 0x2f1   : > { %v1118_v53 = vld [vmem:[#allocation2 + $0x67] sm:$0xff]  ;;  %v1238_v7 = vmul.f32 %v3801_v0, %v3789_v55  ;;  %v991_v9 = vadd.f32 %v990_v27, %v3741_v24  ;;  %v3878_v17 = vmul.f32 %v3794_v14, %v1255_v59  ;;  %v3886_v25 = vmul.f32 %v3831_v16, %v1255_v59 }
 0x2f2   : > { %v1244_v46 = vadd.f32 %v1236_v13, %v1223_v20  ;;  %v1152_v49 = vadd.f32 %v1144_v32, %v1131_v21  ;;  %v1172_v50 = vadd.f32 %v1164_v35, %v1151_v29  ;;  %v1165_v60 = vmul.f32 %v3771_v47, %v1118_v53  ;;  %v1256_v29 = vld [vmem:[#allocation2 + $0x69] sm:$0xff] }
 0x2f3   : > { %v1145_v62 = vmul.f32 %v3759_v41, %v1118_v53  ;;  %v3889_v55 = vmul.f32 %v3811_v22, %v1255_v59  ;;  %1111 = vst [vmem:[#allocation2 + $0x98] sm:$0xff] %v991_v9  ;;  %v2873_v59 = vld [vmem:[#allocation9 + $0x28] sm:$0xff]  }
 0x2f4   : > { %v1203_v61 = vadd.f32 %v1195_v6, %v1172_v50  ;;  %v994_v2 = vpop.f32.mrb[12].mxu0  ;;  %v1173_v4 = vadd.f32 %v1165_v60, %v1152_v49  ;;  %v1275_v13 = vadd.f32 %v3804_v1, %v1244_v46  ;;  %v3894_v49 = vmul.f32 %v3780_v52, %v3835_v19  ;;  %2642 = vmatprep.subr.bf16.mxu0 %v2873_v59 }
 0x2f5   : > { %v996_v6 = vpop.f32.mrb[13].mxu0  ;;  %v3881_v18 = vadd.f32 %v994_v2, %v3731_v48  ;;  %v1153_v32 = vadd.f32 %v1145_v62, %v1132_v3  ;;  %v1133_v1 = vmul.f32 %v3754_v37, %v1118_v53  ;;  %v1291_v60 = vmul.f32 %v3831_v16, %v1256_v29  ;;  %2643 = vmatpush3.bf16.msra.mxu0 %v2873_v59 }
 0x2f6   : > { %v1224_v23 = vadd.f32 %v1216_v56, %v1203_v61  ;;  %v997_v11 = vadd.f32 %v996_v6, %v3741_v24  ;;  %v998_v21 = vpop.f32.mrb[14].mxu0  ;;  %v1204_v27 = vadd.f32 %v1196_v30, %v1173_v4  ;;  %v1219_v30 = vmul.f32 %v3785_v36, %v3835_v19 }
 0x2f7   : > { %v1119_v56 = vld [vmem:[#allocation2 + $0x7f] sm:$0xff]  ;;  %v1000_v20 = vpop.f32.mrb[15].mxu0  ;;  %v1311_v61 = vmul.f32 %v3811_v22, %v1256_v29  ;;  %v1296_v2 = vadd.f32 %v1288_v39, %v1275_v13  ;;  %v3908_v3 = vadd.f32 %v998_v21, %v3731_v48  ;;  %v3911_v6 = vmul.f32 %v3780_v52, %v991_v9 }
 0x2f8   : > { %v1245_v26 = vadd.f32 %v1237_v51, %v1224_v23  ;;  %v1166_v35 = vmul.f32 %v3771_v47, %v1119_v56  ;;  %1112 = vst [vmem:[#allocation2 + $0xb0] sm:$0xff] %v997_v11  ;;  %v1225_v46 = vadd.f32 %v1217_v44, %v1204_v27  ;;  %v1146_v50 = vmul.f32 %v3759_v41, %v1119_v56  ;;  %v1257_v53 = vld [vmem:[#allocation2 + $0x81] sm:$0xff] }
 0x2f9   : > { %v3901_v51 = vmul.f32 %v3794_v14, %v1256_v29  ;;  %v1239_v44 = vmul.f32 %v3801_v0, %v3835_v19  ;;  %v1220_v23 = vmul.f32 %v3785_v36, %v991_v9  ;;  %v1001_v27 = vadd.f32 %v1000_v20, %v3741_v24 }
 0x2fa   : > { %v1174_v62 = vadd.f32 %v1166_v35, %v1153_v32  ;;  %v1246_v28 = vadd.f32 %v1238_v7, %v1225_v46  ;;  %v1276_v29 = vadd.f32 %v3847_v40, %v1245_v26  ;;  %v1134_v39 = vmul.f32 %v3754_v37, %v1119_v56  ;;  %v1120_v32 = vld [vmem:[#allocation2 + $0x97] sm:$0xff] }
 0x2fb   : > { %v1154_v7 = vadd.f32 %v1146_v50, %v1133_v1  ;;  %v1240_v19 = vmul.f32 %v3801_v0, %v991_v9  ;;  %v1272_v48 = vmul.f32 %v3794_v14, %v1257_v53  ;;  %v1312_v21 = vmul.f32 %v3811_v22, %v1257_v53  ;;  %1113 = vst [vmem:[#allocation2 + $0xc8] sm:$0xff] %v1001_v27 }
 0x2fc   : > { %v1205_v4 = vadd.f32 %v1197_v43, %v1174_v62  ;;  %v1292_v43 = vmul.f32 %v3831_v16, %v1257_v53  ;;  %v1277_v24 = vadd.f32 %v3857_v54, %v1246_v28  ;;  %v1147_v12 = vmul.f32 %v3759_v41, %v1120_v32  ;;  %v1258_v54 = vld [vmem:[#allocation2 + $0x99] sm:$0xff] }
 0x2fd   : > { %v1167_v40 = vmul.f32 %v3771_v47, %v1120_v32  ;;  %v3925_v20 = vadd.f32 %v3863_v58, %v1296_v2  ;;  %v1221_v26 = vmul.f32 %v3785_v36, %v997_v11  ;;  %v1241_v35 = vmul.f32 %v3801_v0, %v997_v11 }
 0x2fe   : > { %v1226_v13 = vadd.f32 %v1218_v45, %v1205_v4  ;;  %v1201_v45 = vmul.f32 %v3780_v52, %v997_v11  ;;  %v1297_v1 = vadd.f32 %v3860_v57, %v1276_v29  ;;  %v1222_v62 = vmul.f32 %v3785_v36, %v1001_v27 }
 0x2ff   : > { %v1121_v56 = vld [vmem:[#allocation2 + $0xaf] sm:$0xff]  ;;  %v1175_v46 = vadd.f32 %v1167_v40, %v1154_v7  ;;  %v1135_v58 = vmul.f32 %v3754_v37, %v1120_v32  ;;  %v1155_v2 = vadd.f32 %v1147_v12, %v1134_v39  ;;  %v1242_v59 = vmul.f32 %v3801_v0, %v1001_v27 }
 0x300   : > { %v1247_v9 = vadd.f32 %v1239_v44, %v1226_v13  ;;  %v1148_v50 = vmul.f32 %v3759_v41, %v1121_v56  ;;  %v1168_v52 = vmul.f32 %v3771_v47, %v1121_v56  ;;  %v1298_v44 = vadd.f32 %v3886_v25, %v1277_v24 }
 0x301   : > { %v1206_v11 = vadd.f32 %v3869_v63, %v1175_v46  ;;  %v1333_v57 = vmul.f32 0.044715, %v3925_v20  ;;  %v1273_v4 = vmul.f32 %v3794_v14, %v1258_v54  ;;  %v1136_v39 = vmul.f32 %v3754_v37, %v1121_v56  ;;  %v1259_v63 = vld [vmem:[#allocation2 + $0xb1] sm:$0xff] }
 0x302   : > { %v1278_v28 = vadd.f32 %v3878_v17, %v1247_v9  ;;  %v1156_v29 = vadd.f32 %v1148_v50, %v1135_v58  ;;  %v1176_v36 = vadd.f32 %v1168_v52, %v1155_v2  ;;  %v1293_v17 = vmul.f32 %v3831_v16, %v1258_v54  ;;  %v1122_v13 = vld [vmem:[#allocation2 + $0xc7] sm:$0xff] }
 0x303   : > { %v1227_v7 = vadd.f32 %v1219_v30, %v1206_v11  ;;  %v1341_v32 = vmul.f32 %v1333_v57, %v3925_v20  ;;  %v1149_v0 = vmul.f32 %v3759_v41, %v1122_v13  ;;  %v1169_v27 = vmul.f32 %v3771_v47, %v1122_v13  ;;  %v1260_v2 = vld [vmem:[#allocation2 + $0xc9] sm:$0xff] }
 0x304   : > { %v1299_v53 = vadd.f32 %v1291_v60, %v1278_v28  ;;  %v1207_v25 = vadd.f32 %v3894_v49, %v1176_v36  ;;  %v3948_v60 = vadd.f32 %v3889_v55, %v1297_v1  ;;  %v3951_v12 = vadd.f32 %v1311_v61, %v1298_v44 }
 0x305   : > { %v1248_v24 = vadd.f32 %v1240_v19, %v1227_v7  ;;  %v1349_v30 = vmul.f32 %v1341_v32, %v3925_v20  ;;  %v1313_v37 = vmul.f32 %v3811_v22, %v1258_v54  ;;  %v1157_v9 = vadd.f32 %v1149_v0, %v1136_v39 }
 0x306   : > { %v3953_v40 = vadd.f32 %v1312_v21, %v1299_v53  ;;  %v1228_v56 = vadd.f32 %v1220_v23, %v1207_v25  ;;  %v1177_v49 = vadd.f32 %v1169_v27, %v1156_v29  ;;  %v1274_v41 = vmul.f32 %v3794_v14, %v1259_v63 }
 0x307   : > { %v1279_v46 = vadd.f32 %v3901_v51, %v1248_v24  ;;  %v1294_v47 = vmul.f32 %v3831_v16, %v1259_v63  ;;  %v1357_v55 = vadd.f32 %v1349_v30, %v3925_v20  ;;  %v1178_v1 = vadd.f32 %v3814_v15, %v1157_v9 }
 0x308   : > { %v1249_v19 = vadd.f32 %v1241_v35, %v1228_v56  ;;  %v1208_v61 = vadd.f32 %v3911_v6, %v1177_v49  ;;  %v1334_v21 = vmul.f32 0.044715, %v3948_v60  ;;  %v1314_v23 = vmul.f32 %v3811_v22, %v1259_v63 }
 0x309   : > { %v1300_v50 = vadd.f32 %v1292_v43, %v1279_v46  ;;  %v1335_v54 = vmul.f32 0.044715, %v3951_v12  ;;  %v1336_v51 = vmul.f32 0.044715, %v3953_v40  ;;  %v1209_v14 = vadd.f32 %v1201_v45, %v1178_v1 }
 0x30a   : > { %v1280_v28 = vadd.f32 %v1272_v48, %v1249_v19  ;;  %v1229_v58 = vadd.f32 %v1221_v26, %v1208_v61  ;;  %v1342_v52 = vmul.f32 %v1334_v21, %v3948_v60  ;;  %v1365_v35 = vmul.f32 0.7978846, %v1357_v55 }
 0x30b   : > { %v3967_v44 = vadd.f32 %v1313_v37, %v1300_v50  ;;  %v1343_v15 = vmul.f32 %v1335_v54, %v3951_v12  ;;  %v1344_v6 = vmul.f32 %v1336_v51, %v3953_v40  ;;  %v1230_v11 = vadd.f32 %v1222_v62, %v1209_v14 }
 0x30c   : > { %v1301_v43 = vadd.f32 %v1293_v17, %v1280_v28  ;;  %v1250_v57 = vadd.f32 %v1242_v59, %v1229_v58  ;;  %v1350_v53 = vmul.f32 %v1342_v52, %v3948_v60  ;;  %v1295_v29 = vmul.f32 %v3831_v16, %v1260_v2 }
 0x30d   : > { %v1337_v48 = vmul.f32 0.044715, %v3967_v44  ;;  %v1351_v45 = vmul.f32 %v1343_v15, %v3951_v12  ;;  %v1352_v26 = vmul.f32 %v1344_v6, %v3953_v40  ;;  %v1251_v36 = vadd.f32 %v3817_v5, %v1230_v11 }
 0x30e   : > { %v1281_v7 = vadd.f32 %v1273_v4, %v1250_v57  ;;  %v3977_v39 = vadd.f32 %v1314_v23, %v1301_v43  ;;  %v1358_v13 = vadd.f32 %v1350_v53, %v3948_v60  ;;  %2908 = vtanh.f32 %v1365_v35 }
 0x30f   : > { %v1345_v62 = vmul.f32 %v1337_v48, %v3967_v44  ;;  %v1359_v59 = vadd.f32 %v1351_v45, %v3951_v12  ;;  %v1360_v16 = vadd.f32 %v1352_v26, %v3953_v40  ;;  %v1282_v17 = vadd.f32 %v1274_v41, %v1251_v36 }
 0x310   : > { %v1302_v32 = vadd.f32 %v1294_v47, %v1281_v7  ;;  %v1315_v25 = vmul.f32 %v3811_v22, %v1260_v2  ;;  %v1338_v63 = vmul.f32 0.044715, %v3977_v39  ;;  %v1366_v4 = vmul.f32 0.7978846, %v1358_v13 }
 0x311   : > { %v1353_v5 = vmul.f32 %v1345_v62, %v3967_v44  ;;  %v1367_v0 = vmul.f32 0.7978846, %v1359_v59  ;;  %v1303_v27 = vadd.f32 %v1295_v29, %v1282_v17  ;;  %v1368_v56 = vmul.f32 0.7978846, %v1360_v16 }
 0x312   : > { %v1323_v24 = vadd.f32 %v1315_v25, %v1302_v32  ;;  %v1346_v30 = vmul.f32 %v1338_v63, %v3977_v39  ;;  %2910 = vtanh.f32 %v1366_v4  ;;  %v1325_v2 = vmul.f32 0.5, %v3925_v20 }
 0x313   : > { %v1361_v37 = vadd.f32 %v1353_v5, %v3967_v44  ;;  %v1324_v9 = vadd.f32 %v3825_v10, %v1303_v27  ;;  %2912 = vtanh.f32 %v1367_v0  ;;  %v1326_v52 = vmul.f32 0.5, %v3948_v60 }
 0x314   : > { %v1339_v49 = vmul.f32 0.044715, %v1323_v24  ;;  %v1354_v46 = vmul.f32 %v1346_v30, %v3977_v39  ;;  %2914 = vtanh.f32 %v1368_v56  ;;  %v1327_v43 = vmul.f32 0.5, %v3951_v12 }
 0x315   : > { %v1369_v22 = vmul.f32 0.7978846, %v1361_v37  ;;  %v1340_v47 = vmul.f32 0.044715, %v1324_v9  ;;  %v1328_v45 = vmul.f32 0.5, %v3953_v40  ;;  %v1329_v60 = vmul.f32 0.5, %v3967_v44 }
 0x316   : > { %v1347_v55 = vmul.f32 %v1339_v49, %v1323_v24  ;;  %v1362_v19 = vadd.f32 %v1354_v46, %v3977_v39  ;;  %v1330_v12 = vmul.f32 0.5, %v3977_v39  ;;  %v1331_v40 = vmul.f32 0.5, %v1323_v24 }
 0x317   : > { %v3990_v41 = vpop.permute.xlu1 %1428  ;;  %v1348_v1 = vmul.f32 %v1340_v47, %v1324_v9  ;;  %2916 = vtanh.f32 %v1369_v22  ;;  %v1332_v56 = vmul.f32 0.5, %v1324_v9 }
 0x318   : > { %v1355_v61 = vmul.f32 %v1347_v55, %v1323_v24  ;;  %v2909_v21 = vpop.eup %2908  ;;  %v1370_v50 = vmul.f32 0.7978846, %v1362_v19 }
 0x319   : > { %v1356_v23 = vmul.f32 %v1348_v1, %v1324_v9  ;;  %v1381_v10 = vadd.f32 1.0, %v2909_v21 }
 0x31a   : > { %v1363_v54 = vadd.f32 %v1355_v61, %v1323_v24  ;;  %2918 = vtanh.f32 %v1370_v50 }
 0x31b   : > { %v1364_v51 = vadd.f32 %v1356_v23, %v1324_v9  ;;  %v1389_v11 = vmul.f32 %v1381_v10, %v1325_v2 }
 0x31c   : > { %v1371_v28 = vmul.f32 0.7978846, %v1363_v54  ;;  %v3993_v14 = vpop.permute.xlu1 %1471  ;;  %v2911_v58 = vpop.eup %2910 }
 0x31d   : > { %v1372_v35 = vmul.f32 0.7978846, %v1364_v51  ;;  %v1382_v15 = vadd.f32 1.0, %v2911_v58  ;;  %v2913_v6 = vpop.eup %2912 }
 0x31e   : > { %2920 = vtanh.f32 %v1371_v28  ;;  %v1383_v57 = vadd.f32 1.0, %v2913_v6  ;;  %v2915_v29 = vpop.eup %2914 }
 0x31f   : > { %2922 = vtanh.f32 %v1372_v35  ;;  %v1390_v53 = vmul.f32 %v1382_v15, %v1326_v52  ;;  %v1384_v26 = vadd.f32 1.0, %v2915_v29  ;;  %v1424_v35 = vpop.permute.xlu0 %1423 }
 0x320   : > { %v1391_v36 = vmul.f32 %v1383_v57, %v1327_v43  ;;  %v1477_v20 = vpop.permute.xlu1 %1476 }
 0x321   : > { %v2917_v48 = vpop.eup %2916  ;;  %v1397_v7 = vadd.f32 %v1390_v53, %v1389_v11  ;;  %v1392_v62 = vmul.f32 %v1384_v26, %v1328_v45  ;;  %v1461_v26 = vmul.f32 %v1424_v35, %v1389_v11 }
 0x322   : > { %v1385_v13 = vadd.f32 1.0, %v2917_v48 }
 0x323   : > { %v1398_v59 = vadd.f32 %v1397_v7, %v1391_v36  ;;  %v1462_v7 = vmul.f32 %v3990_v41, %v1390_v53 }
 0x324   : > { %v2919_v16 = vpop.eup %2918  ;;  %v1393_v17 = vmul.f32 %v1385_v13, %v1329_v60 }
 0x325   : > { %v1386_v32 = vadd.f32 1.0, %v2919_v16  ;;  %v1399_v25 = vadd.f32 %v1398_v59, %v1392_v62  ;;  %v1434_v0 = vpop.permute.xlu1 %1433 }
 0x326   : > { %v1463_v13 = vmul.f32 %v1434_v0, %v1391_v36 }
 0x327   : > { %v1394_v5 = vmul.f32 %v1386_v32, %v1330_v12  ;;  %v1400_v4 = vadd.f32 %v1399_v25, %v1393_v17  ;;  %v1449_v15 = vpop.permute.xlu0 %1448 }
 0x328   : > { %v2921_v63 = vpop.eup %2920 }
 0x329   : > { %v1387_v27 = vadd.f32 1.0, %v2921_v63  ;;  %v2923_v30 = vpop.eup %2922  ;;  %v1401_v37 = vadd.f32 %v1400_v4, %v1394_v5  ;;  %v1439_v47 = vpop.permute.xlu1 %1438  ;;  %v1466_v16 = vmul.f32 %v1449_v15, %v1394_v5 }
 0x32a   : > { %v1388_v49 = vadd.f32 1.0, %v2923_v30  ;;  %v1464_v59 = vmul.f32 %v1439_v47, %v1392_v62  ;;  %v2874_v47 = vld [vmem:[#allocation9 + $0x30] sm:$0xff]  }
 0x32b   : > { %v1395_v44 = vmul.f32 %v1387_v27, %v1331_v40  ;;  %2644 = vmatprep.subr.bf16.mxu0 %v2874_v47 }
 0x32c   : > { %v1396_v46 = vmul.f32 %v1388_v49, %v1332_v56  ;;  %v1497_v43 = vpop.permute.xlu0 %1496  ;;  %2645 = vmatpush3.bf16.msra.mxu0 %v2874_v47 }
 0x32d   : > { %v1402_v22 = vadd.f32 %v1401_v37, %v1395_v44 }
 0x32e   : > { %v1482_v39 = vpop.permute.xlu1 %1481 }
 0x32f   : > { %v1403_v55 = vadd.f32 %v1402_v22, %v1396_v46 }
 0x330   : > { %v1502_v30 = vpop.permute.xlu0 %1501 }
 0x331   : > { %v1404_v19 = vrot.slane %v1403_v55, 4 }
 0x332   : > { %v1487_v23 = vpop.permute.xlu1 %1486 }
 0x333   : > { %v1405_v1 = vadd.f32 %v1404_v19, %v1403_v55  ;;  %v2875_v19 = vld [vmem:[#allocation9 + $0x38] sm:$0xff]  }
 0x334   : > { %2646 = vmatprep.subr.bf16.mxu0 %v2875_v19 }
 0x335   : > { %v1406_v61 = vrot.slane %v1405_v1, 2  ;;  %2647 = vmatpush3.bf16.msra.mxu0 %v2875_v19 }
 0x337   : > { %v1407_v21 = vadd.f32 %v1406_v61, %v1405_v1  ;;  %v1444_v51 = vpop.permute.xlu1 %1443  ;;  %v2515_v1 = vld [vmem:[%s4302_s3] ss:$0 sm:$0xff] }
 0x338   : > { %v1465_v12 = vmul.f32 %v1444_v51, %v1393_v17 }
 0x339   : > { %v1408_v50 = vrot.slane %v1407_v21, 1 }
 0x33b   : > { %v1409_v54 = vadd.f32 %v1408_v50, %v1407_v21 }
 0x33c   : > { %v1492_v2 = vpop.permute.xlu1 %1491 }
 0x33d   : > { %v1411_v10 = vmul.f32 0.015625, %v1409_v54 }
 0x33f   : > { %v1413_v24 = vmul.f32 0.044715, %v1411_v10  ;;  %v1412_v48 = vmul.f32 0.5, %v1411_v10 }
 0x341   : > { %v1414_v28 = vmul.f32 %v1413_v24, %v1411_v10  ;;  %v1454_v6 = vpop.permute.xlu1 %1453 }
 0x342   : > { %v1467_v32 = vmul.f32 %v1454_v6, %v1395_v44 }
 0x343   : > { %v1415_v58 = vmul.f32 %v1414_v28, %v1411_v10 }
 0x345   : > { %v1416_v9 = vadd.f32 %v1415_v58, %v1411_v10  ;;  %v1459_v57 = vpop.permute.xlu1 %1458 }
 0x346   : > { %v1468_v25 = vmul.f32 %v1459_v57, %v1396_v46 }
 0x347   : > { %v1417_v52 = vmul.f32 0.7978846, %v1416_v9 }
 0x349   : > { %2924 = vtanh.f32 %v1417_v52 }
 0x34a   : > { %v1507_v37 = vpop.permute.xlu1 %1506 }
 0x353   : > { %v2925_v29 = vpop.eup %2924 }
 0x354   : > { %v1419_v45 = vadd.f32 1.0, %v2925_v29 }
 0x356   : > { %v1420_v60 = vmul.f32 %v1419_v45, %v1412_v48 }
 0x358   : > { %v1509_v63 = vmul.f32 %v3993_v14, %v1420_v60  ;;  %v1510_v4 = vmul.f32 %v1477_v20, %v1420_v60  ;;  %v1514_v40 = vmul.f32 %v1497_v43, %v1420_v60  ;;  %v1511_v27 = vmul.f32 %v1482_v39, %v1420_v60 }
 0x359   : > { %v1515_v56 = vmul.f32 %v1502_v30, %v1420_v60  ;;  %v1512_v49 = vmul.f32 %v1487_v23, %v1420_v60  ;;  %v1513_v22 = vmul.f32 %v1492_v2, %v1420_v60  ;;  %v1516_v11 = vmul.f32 %v1507_v37, %v1420_v60 }
 0x35a   : > { %v1522_v55 = vadd.f32 %v1514_v40, %v1466_v16  ;;  %v1519_v41 = vadd.f32 %v1511_v27, %v1463_v13  ;;  %v1517_v53 = vadd.f32 %v1509_v63, %v1461_v26  ;;  %v1518_v36 = vadd.f32 %v1510_v4, %v1462_v7  ;;  %v2960_v4 = vld [vmem:[%s3578_s15 + $0x10] sm:$0xff] }
 0x35b   : > { %v1520_v62 = vadd.f32 %v1512_v49, %v1464_v59  ;;  %v1521_v5 = vadd.f32 %v1513_v22, %v1465_v12  ;;  %v1523_v17 = vadd.f32 %v1515_v56, %v1467_v32  ;;  %v1524_v0 = vadd.f32 %v1516_v11, %v1468_v25  ;;  %v2958_v32 = vld [vmem:[%s3578_s15] sm:$0xff]  ;;  %v2959_v25 = vld [vmem:[%s3578_s15 + $0x8] sm:$0xff]  ;;  %v2961_v11 = vld [vmem:[%s3578_s15 + $0x18] sm:$0xff] }
 0x35c   : > { %v1525_v44 = vpack.c.bf16 %v1518_v36, %v1517_v53  ;;  %v2962_v53 = vld [vmem:[%s3578_s15 + $0x20] sm:$0xff] }
 0x35d   : > { %v1526_v46 = vpack.c.bf16 %v1520_v62, %v1519_v41  ;;  %v1527_v14 = vpack.c.bf16 %v1522_v55, %v1521_v5  ;;  %v1528_v20 = vpack.c.bf16 %v1524_v0, %v1523_v17  ;;  %v2963_v5 = vld [vmem:[%s3578_s15 + $0x30] sm:$0xff] }
 0x35e   : > { %2624 = vmatprep.mubr.bf16.mxu1 %v1525_v44  ;;  %v2964_v44 = vld [vmem:[%s3578_s15 + $0x28] sm:$0xff] }
 0x35f   : > { %2625 = vmatmul.mubr.bf16.vlgmr.msra.gmra.mrb[0].mxu1 %v1526_v46 }
 0x360   : > { %2628 = vmatprep.mubr.bf16.mxu1 %v1527_v14  ;;  %v2965_v14 = vld [vmem:[%s3578_s15 + $0x38] sm:$0xff]  ;;  %s4307_s15 = sld [smem:[#allocation29_spill]] }
 0x367   : > { %2629 = vmatmul.mubr.bf16.gmra.mrb[4].mxu1 %v1528_v20 }
 0x432   : > { %v2626_v39 = vpop.f32.mrb[0].mxu1 }
 0x433   : > { %v1643_v61 = vadd.f32 %v2626_v39, %v2515_v1  ;;  %v1634_v21 = vpop.f32.mrb[1].mxu1 }
 0x434   : > { %v1635_v50 = vadd.f32 %v2515_v1, %v1634_v21  ;;  %v2627_v23 = vpop.f32.mrb[2].mxu1 }
 0x435   : > { %v1667_v54 = vmul.f32 %v1643_v61, %v3762_v42  ;;  %v1646_v10 = vadd.f32 %v2627_v23, %v2515_v1  ;;  %v1637_v24 = vpop.f32.mrb[3].mxu1 }
 0x436   : > { %v1665_v51 = vmul.f32 %v1635_v50, %v3744_v38  ;;  %v1638_v28 = vadd.f32 %v2515_v1, %v1637_v24 }
 0x437   : > { %v1668_v58 = vmul.f32 %v1646_v10, %v3774_v34 }
 0x438   : > { %v1666_v9 = vmul.f32 %v1638_v28, %v3748_v33 }
 0x439   : > { %v1674_v2 = vpack.c.bf16 %v1668_v58, %v1667_v54 }
 0x43a   : > { %v2630_v52 = vpop.f32.mrb[4].mxu1  ;;  %v1673_v35 = vpack.c.bf16 %v1666_v9, %v1665_v51 }
 0x43b   : > { %v1659_v15 = vadd.f32 %v2630_v52, %v2515_v1  ;;  %v1650_v6 = vpop.f32.mrb[5].mxu1 }
 0x43c   : > { %v1651_v43 = vadd.f32 %v2515_v1, %v1650_v6  ;;  %v2631_v57 = vpop.f32.mrb[6].mxu1  ;;  %2648 = vmatprep.mubr.bf16.mxu0 %v1673_v35 }
 0x43d   : > { %v1671_v29 = vmul.f32 %v1659_v15, %v3881_v18  ;;  %v1662_v42 = vadd.f32 %v2631_v57, %v2515_v1  ;;  %v1653_v48 = vpop.f32.mrb[7].mxu1  ;;  %2649 = vmatmul.mubr.bf16.vlgmr.msra.gmra.mrb[16].mxu0 %v1674_v2  ;;  %v2524_v18 = vld [vmem:[%s4303_s25] ss:$0 sm:$0xff] }
 0x43e   : > { %v1669_v38 = vmul.f32 %v1651_v43, %v3822_v8  ;;  %v1654_v45 = vadd.f32 %v2515_v1, %v1653_v48 }
 0x43f   : > { %v1672_v34 = vmul.f32 %v1662_v42, %v3908_v3 }
 0x440   : > { %v1670_v33 = vmul.f32 %v1654_v45, %v3841_v31 }
 0x441   : > { %v1676_v26 = vpack.c.bf16 %v1672_v34, %v1671_v29 }
 0x442   : > { %v1675_v7 = vpack.c.bf16 %v1670_v33, %v1669_v38 }
 0x444   : > { %2652 = vmatprep.mubr.bf16.mxu0 %v1675_v7 }
 0x445   : > { %2653 = vmatmul.mubr.bf16.gmra.mrb[20].mxu0 %v1676_v26 }
 0x510   : > { %v2650_v60 = vpop.f32.mrb[16].mxu0 }
 0x511   : > { %v1782_v13 = vpop.f32.mrb[17].mxu0  ;;  %v1791_v12 = vadd.f32 %v2650_v60, %v2524_v18  ;;  %v2876_v60 = vld [vmem:[#allocation11] sm:$0xff]  }
 0x512   : > { %v1783_v59 = vadd.f32 %v2524_v18, %v1782_v13  ;;  %v2651_v16 = vpop.f32.mrb[18].mxu0  ;;  %2656 = vmatprep.subr.bf16.mxu1 %v2876_v60  ;;  %v2877_v13 = vld [vmem:[#allocation11 + $0x8] sm:$0xff]  }
 0x513   : > { %v1785_v8 = vpop.f32.mrb[19].mxu0  ;;  %v4025_v40 = vadd.f32 %v2960_v4, %v1791_v12  ;;  %v1794_v27 = vadd.f32 %v2651_v16, %v2524_v18  ;;  %2657 = vmatpush3.bf16.msra.mxu1 %v2876_v60  ;;  %v2879_v16 = vld [vmem:[#allocation11 + $0x18] sm:$0xff]   ;;  %v2881_v12 = vld [vmem:[#allocation11 + $0x28] sm:$0xff]  }
 0x514   : > { %v4018_v3 = vadd.f32 %v2958_v32, %v1783_v59  ;;  %v1786_v31 = vadd.f32 %v2524_v18, %v1785_v8  ;;  %2658 = vmatprep.subr.bf16.mxu1 %v2877_v13  ;;  %v2878_v59 = vld [vmem:[#allocation11 + $0x10] sm:$0xff]   ;;  %v2880_v8 = vld [vmem:[#allocation11 + $0x20] sm:$0xff]  }
 0x515   : > { %v4030_v55 = vadd.f32 %v2961_v11, %v1794_v27  ;;  %v2882_v32 = vld [vmem:[#allocation11 + $0x30] sm:$0xff]  }
 0x516   : > { %v4021_v63 = vadd.f32 %v2959_v25, %v1786_v31  ;;  %1823 = vadd.xlane.f32.xlu0 %v4018_v3  ;;  %v2883_v31 = vld [vmem:[#allocation11 + $0x38] sm:$0xff]  }
 0x517   : > { %2659 = vmatpush3.bf16.msra.mxu1 %v2877_v13 }
 0x518   : > { %1825 = vadd.xlane.f32.xlu1 %v4021_v63  ;;  %v2654_v30 = vpop.f32.mrb[20].mxu0  ;;  %2660 = vmatprep.subr.bf16.mxu1 %v2878_v59 }
 0x519   : > { %v1798_v37 = vpop.f32.mrb[21].mxu0  ;;  %v1807_v41 = vadd.f32 %v2654_v30, %v2524_v18 }
 0x51a   : > { %v1799_v56 = vadd.f32 %v2524_v18, %v1798_v37  ;;  %1827 = vadd.xlane.f32.xlu0 %v4025_v40  ;;  %v2655_v49 = vpop.f32.mrb[22].mxu0 }
 0x51b   : > { %v1801_v22 = vpop.f32.mrb[23].mxu0  ;;  %v4038_v17 = vadd.f32 %v2963_v5, %v1807_v41  ;;  %v1810_v0 = vadd.f32 %v2655_v49, %v2524_v18  ;;  %2661 = vmatpush3.bf16.msra.mxu1 %v2878_v59 }
 0x51c   : > { %v4033_v36 = vadd.f32 %v2962_v53, %v1799_v56  ;;  %v1802_v62 = vadd.f32 %v2524_v18, %v1801_v22  ;;  %2662 = vmatprep.subr.bf16.mxu1 %v2879_v16 }
 0x51d   : > { %v4046_v20 = vadd.f32 %v2965_v14, %v1810_v0 }
 0x51e   : > { %1829 = vadd.xlane.f32.xlu0 %v4030_v55  ;;  %1831 = vadd.xlane.f32.xlu1 %v4033_v36  ;;  %v4041_v46 = vadd.f32 %v2964_v44, %v1802_v62 }
 0x51f   : > { %2663 = vmatpush3.bf16.msra.mxu1 %v2879_v16 }
 0x520   : > { %2664 = vmatprep.subr.bf16.mxu1 %v2880_v8 }
 0x522   : > { %1833 = vadd.xlane.f32.xlu0 %v4041_v46  ;;  %1835 = vadd.xlane.f32.xlu1 %v4038_v17 }
 0x523   : > { %2665 = vmatpush3.bf16.msra.mxu1 %v2880_v8 }
 0x524   : > { %2666 = vmatprep.subr.bf16.mxu1 %v2881_v12 }
 0x526   : > { %1837 = vadd.xlane.f32.xlu0 %v4046_v20 }
 0x527   : > { %2667 = vmatpush3.bf16.msra.mxu1 %v2881_v12 }
 0x528   : > { %2668 = vmatprep.subr.bf16.mxu1 %v2882_v32 }
 0x52b   : > { %2669 = vmatpush3.bf16.msra.mxu1 %v2882_v32 }
 0x52c   : > { %2670 = vmatprep.subr.bf16.mxu1 %v2883_v31 }
 0x52f   : > { %2671 = vmatpush3.bf16.msra.mxu1 %v2883_v31 }
 0x5a3   : > { %v1824_v47 = vpop.xlane.xlu0 %1823 }
 0x5a4   : > { %v4049_v19 = vmul.f32 0.03125, %v1824_v47 }
 0x5a5   : > { %v1826_v1 = vpop.xlane.xlu1 %1825 }
 0x5a6   : > { %v4051_v39 = vmul.f32 0.03125, %v1826_v1  ;;  %v4055_v61 = vsub.f32 %v4018_v3, %v4049_v19  ;;  %v1879_v25 = vmul.f32 96.0, %v4049_v19 }
 0x5a7   : > { %v1828_v21 = vpop.xlane.xlu0 %1827 }
 0x5a8   : > { %v4057_v50 = vmul.f32 0.03125, %v1828_v21  ;;  %v1855_v23 = vmul.f32 %v4055_v61, %v4055_v61  ;;  %v4063_v54 = vsub.f32 %v4021_v63, %v4051_v39  ;;  %v1880_v4 = vmul.f32 96.0, %v4051_v39 }
 0x5a9   : > { %v1887_v27 = vmul.f32 %v1879_v25, %v4049_v19 }
 0x5aa   : > { %1863 = vadd.xlane.f32.xlu1 %v1855_v23  ;;  %v1856_v10 = vmul.f32 %v4063_v54, %v4063_v54  ;;  %v4069_v24 = vsub.f32 %v4025_v40, %v4057_v50  ;;  %v1881_v30 = vmul.f32 96.0, %v4057_v50  ;;  %v1888_v49 = vmul.f32 %v1880_v4, %v4051_v39 }
 0x5ab   : > { %v1832_v51 = vpop.xlane.xlu1 %1831  ;;  %v1830_v28 = vpop.xlane.xlu0 %1829 }
 0x5ac   : > { %v4071_v58 = vmul.f32 0.03125, %v1832_v51  ;;  %v4073_v9 = vmul.f32 0.03125, %v1830_v28  ;;  %1865 = vadd.xlane.f32.xlu0 %v1856_v10  ;;  %v1857_v2 = vmul.f32 %v4069_v24, %v4069_v24  ;;  %v1889_v62 = vmul.f32 %v1881_v30, %v4057_v50 }
 0x5ae   : > { %1867 = vadd.xlane.f32.xlu1 %v1857_v2  ;;  %v4079_v52 = vsub.f32 %v4033_v36, %v4071_v58  ;;  %v4083_v35 = vsub.f32 %v4030_v55, %v4073_v9  ;;  %v1883_v11 = vmul.f32 96.0, %v4071_v58  ;;  %v1882_v5 = vmul.f32 96.0, %v4073_v9 }
 0x5af   : > { %v1836_v15 = vpop.xlane.xlu1 %1835  ;;  %v1834_v6 = vpop.xlane.xlu0 %1833 }
 0x5b0   : > { %v4085_v43 = vmul.f32 0.03125, %v1836_v15  ;;  %v4087_v57 = vmul.f32 0.03125, %v1834_v6  ;;  %v1859_v29 = vmul.f32 %v4079_v52, %v4079_v52  ;;  %v1858_v42 = vmul.f32 %v4083_v35, %v4083_v35 }
 0x5b1   : > { %v1891_v19 = vmul.f32 %v1883_v11, %v4071_v58  ;;  %v1890_v10 = vmul.f32 %v1882_v5, %v4073_v9 }
 0x5b2   : > { %1871 = vadd.xlane.f32.xlu1 %v1859_v29  ;;  %1869 = vadd.xlane.f32.xlu0 %v1858_v42  ;;  %v4095_v48 = vsub.f32 %v4038_v17, %v4085_v43  ;;  %v4099_v38 = vsub.f32 %v4041_v46, %v4087_v57  ;;  %v1885_v1 = vmul.f32 96.0, %v4085_v43  ;;  %v1884_v21 = vmul.f32 96.0, %v4087_v57 }
 0x5b3   : > { %v1838_v45 = vpop.xlane.xlu0 %1837 }
 0x5b4   : > { %v4101_v34 = vmul.f32 0.03125, %v1838_v45  ;;  %v1861_v33 = vmul.f32 %v4095_v48, %v4095_v48  ;;  %v1860_v26 = vmul.f32 %v4099_v38, %v4099_v38  ;;  %v1893_v6 = vmul.f32 %v1885_v1, %v4085_v43 }
 0x5b5   : > { %v1892_v29 = vmul.f32 %v1884_v21, %v4087_v57  ;;  %v2533_v57 = vld [vmem:[%s4304_s0] ss:$0 sm:$0xff]  ;;  %s2345_s0 = sshll.u32 %s666_s17, 4  ;;  %s4192_s0 = int_to_ptr.vmem [resolvable:$true] %s2345_s0 }
 0x5b6   : > { %1875 = vadd.xlane.f32.xlu1 %v1861_v33  ;;  %1873 = vadd.xlane.f32.xlu0 %v1860_v26  ;;  %v4109_v7 = vsub.f32 %v4046_v20, %v4101_v34  ;;  %v1886_v45 = vmul.f32 96.0, %v4101_v34  ;;  %s3136_s3 = scalar_lea.vmem %s4192_s0, 1024 }
 0x5b7   : > { %p3137_p2 = scmp.ne.s32.totalorder %s4192_s0, %s3136_s3 }
 0x5b8   : > { %v1862_v18 = vmul.f32 %v4109_v7, %v4109_v7  ;;  %v1894_v8 = vmul.f32 %v1886_v45, %v4101_v34  ;;  %v2884_v45 = vld [vmem:[#allocation12] sm:$0xff]  }
 0x5b9   : > { %2680 = vmatprep.subr.bf16.mxu0 %v2884_v45  ;;  %2704 = vmatprep.subr.bf16.mxu1 %v2884_v45  ;;  %p3138_p10 = pnand %p3137_p2, %p4309_p7 }
 0x5ba   : > { %1877 = vadd.xlane.f32.xlu0 %v1862_v18  ;;  %2681 = vmatpush3.bf16.msra.mxu0 %v2884_v45 }
 0x5bb   : > { %p3139_p1 = pneg %p3138_p10 }
 0x637   : > { %v1864_v37 = vpop.xlane.xlu1 %1863 }
 0x638   : > { %v1895_v56 = vsub.f32 %v1864_v37, %v1887_v27 }
 0x639   : > { %v1866_v22 = vpop.xlane.xlu0 %1865 }
 0x63a   : > { %v1903_v41 = vmul.f32 0.03125, %v1895_v56  ;;  %v1896_v53 = vsub.f32 %v1866_v22, %v1888_v49  ;;  %v2534_v22 = vld [vmem:[%s4305_s2] ss:$0 sm:$0xff]  ;;  %s4308_s2 = sld [smem:[#allocation30_spill]] }
 0x63b   : > { %v1868_v0 = vpop.xlane.xlu1 %1867 }
 0x63c   : > { %v1911_v44 = vadd.f32 1e-05, %v1903_v41  ;;  %v1904_v14 = vmul.f32 0.03125, %v1896_v53  ;;  %v1897_v47 = vsub.f32 %v1868_v0, %v1889_v62 }
 0x63e   : > { %2926 = vrsqrt.f32 %v1911_v44  ;;  %v1912_v39 = vadd.f32 1e-05, %v1904_v14  ;;  %v1905_v23 = vmul.f32 0.03125, %v1897_v47 }
 0x63f   : > { %v1872_v51 = vpop.xlane.xlu1 %1871  ;;  %v1870_v28 = vpop.xlane.xlu0 %1869 }
 0x640   : > { %2928 = vrsqrt.f32 %v1912_v39  ;;  %v1913_v50 = vadd.f32 1e-05, %v1905_v23  ;;  %v1899_v2 = vsub.f32 %v1872_v51, %v1891_v19  ;;  %v1898_v15 = vsub.f32 %v1870_v28, %v1890_v10  ;;  %s4199_s1 = scalar_lea.hbm %s4308_s2, %s2559_s20 }
 0x642   : > { %2930 = vrsqrt.f32 %v1913_v50  ;;  %v1907_v58 = vmul.f32 0.03125, %v1899_v2  ;;  %v1906_v42 = vmul.f32 0.03125, %v1898_v15 }
 0x643   : > { %v1876_v33 = vpop.xlane.xlu1 %1875  ;;  %v1874_v26 = vpop.xlane.xlu0 %1873 }
 0x644   : > { %v1915_v18 = vadd.f32 1e-05, %v1907_v58  ;;  %v1914_v60 = vadd.f32 1e-05, %v1906_v42  ;;  %v1901_v9 = vsub.f32 %v1876_v33, %v1893_v6  ;;  %v1900_v13 = vsub.f32 %v1874_v26, %v1892_v29  ;;  %v2887_v33 = vld [vmem:[#allocation12 + $0x18] sm:$0xff]   ;;  %v2888_v26 = vld [vmem:[#allocation12 + $0x20] sm:$0xff]  }
 0x646   : > { %2932 = vrsqrt.f32 %v1915_v18  ;;  %v1909_v59 = vmul.f32 0.03125, %v1901_v9  ;;  %v1908_v16 = vmul.f32 0.03125, %v1900_v13  ;;  %v2889_v18 = vld [vmem:[#allocation12 + $0x28] sm:$0xff]   ;;  %v2891_v9 = vld [vmem:[#allocation12 + $0x38] sm:$0xff]   ;;  %v2535_v13 = vld [vmem:[%s4306_s23] ss:$0 sm:$0xff] }
 0x647   : > { %2934 = vrsqrt.f32 %v1914_v60  ;;  %v1878_v43 = vpop.xlane.xlu0 %1877  ;;  %v2890_v60 = vld [vmem:[#allocation12 + $0x30] sm:$0xff]   ;;  %s3229_s23 = smov [#allocation14]  }
 0x648   : > { %v2927_v12 = vpop.eup %2926  ;;  %v1917_v32 = vadd.f32 1e-05, %v1909_v59  ;;  %v1916_v31 = vadd.f32 1e-05, %v1908_v16  ;;  %v1902_v25 = vsub.f32 %v1878_v43, %v1894_v8  ;;  %s3140_s19 = sshll.u32 %s3229_s23, 4  ;;  %s3141_s19 = int_to_ptr.vmem [resolvable:$false] %s3140_s19 }
 0x649   : > { %v1927_v4 = vmul.f32 %v2927_v12, %v4055_v61  ;;  %s3142_s25 = scalar_lea.vmem %s3141_s19, 2048  ;;  %p3143_p11 = scmp.lt.s32.totalorder %s4192_s0, %s3141_s19 }
 0x64a   : > { %v2929_v27 = vpop.eup %2928  ;;  %2936 = vrsqrt.f32 %v1917_v32  ;;  %v1910_v30 = vmul.f32 0.03125, %v1902_v25  ;;  %p3144_p12 = scmp.lt.s32.totalorder %s3142_s25, %s3136_s3 }
 0x64b   : > { %2938 = vrsqrt.f32 %v1916_v31  ;;  %v1928_v37 = vmul.f32 %v2929_v27, %v4063_v54  ;;  %v1941_v56 = vmul.f32 %v2533_v57, %v1927_v4 }
 0x64c   : > { %v2931_v34 = vpop.eup %2930  ;;  %v1918_v49 = vadd.f32 1e-05, %v1910_v30  ;;  %p3145_p13 = por %p3144_p12, %p3143_p11 }
 0x64d   : > { %v1942_v11 = vmul.f32 %v2533_v57, %v1928_v37  ;;  %v1929_v41 = vmul.f32 %v2931_v34, %v4069_v24  ;;  %v1955_v53 = vadd.f32 %v2534_v22, %v1941_v56 }
 0x64e   : > { %2940 = vrsqrt.f32 %v1918_v49  ;;  %p3146_p8 = pnand %p3145_p13, %p3139_p1 }
 0x64f   : > { %v1956_v62 = vadd.f32 %v2534_v22, %v1942_v11  ;;  %v1943_v44 = vmul.f32 %v2533_v57, %v1929_v41 }
 0x650   : > { %v2933_v61 = vpop.eup %2932 }
 0x651   : > { %v2935_v5 = vpop.eup %2934  ;;  %v1963_v0 = vpack.c.bf16 %v1956_v62, %v1955_v53  ;;  %v1931_v54 = vmul.f32 %v2933_v61, %v4079_v52  ;;  %v1957_v39 = vadd.f32 %v2534_v22, %v1943_v44 }
 0x652   : > { %v1930_v14 = vmul.f32 %v2935_v5, %v4083_v35 }
 0x653   : > { %2672 = vmatprep.mubr.bf16.mxu1 %v1963_v0  ;;  %v1945_v10 = vmul.f32 %v2533_v57, %v1931_v54 }
 0x654   : > { %v2937_v47 = vpop.eup %2936  ;;  %v1944_v19 = vmul.f32 %v2533_v57, %v1930_v14 }
 0x655   : > { %v2939_v1 = vpop.eup %2938  ;;  %v1933_v21 = vmul.f32 %v2937_v47, %v4095_v48  ;;  %v1959_v35 = vadd.f32 %v2534_v22, %v1945_v10 }
 0x656   : > { %v1958_v23 = vadd.f32 %v2534_v22, %v1944_v19  ;;  %v1932_v24 = vmul.f32 %v2939_v1, %v4099_v38  ;;  %v2885_v38 = vld [vmem:[#allocation12 + $0x8] sm:$0xff]  }
 0x657   : > { %v1947_v15 = vmul.f32 %v2533_v57, %v1933_v21  ;;  %2682 = vmatprep.subr.bf16.mxu0 %v2885_v38 }
 0x658   : > { %v2941_v51 = vpop.eup %2940  ;;  %v1964_v28 = vpack.c.bf16 %v1958_v23, %v1957_v39  ;;  %v1946_v50 = vmul.f32 %v2533_v57, %v1932_v24  ;;  %2683 = vmatpush3.bf16.msra.mxu0 %v2885_v38 }
 0x659   : > { %v1934_v2 = vmul.f32 %v2941_v51, %v4109_v7  ;;  %v1961_v58 = vadd.f32 %v2534_v22, %v1947_v15  ;;  %v2886_v7 = vld [vmem:[#allocation12 + $0x10] sm:$0xff]  }
 0x65a   : > { %2673 = vmatmul.mubr.bf16.vlgmr.msra.gmra.mrb[8].mxu1 %v1964_v28  ;;  %v1960_v52 = vadd.f32 %v2534_v22, %v1946_v50  ;;  %2684 = vmatprep.subr.bf16.mxu0 %v2886_v7 }
 0x65b   : > { %v1948_v6 = vmul.f32 %v2533_v57, %v1934_v2  ;;  %2712 = vmatpush3.bf16.msra.mxu1 %v2884_v45 }
 0x65c   : > { %v1965_v29 = vpack.c.bf16 %v1960_v52, %v1959_v35  ;;  %2705 = vmatprep.subr.bf16.mxu1 %v2885_v38  ;;  %2685 = vmatpush3.bf16.msra.mxu0 %v2886_v7 }
 0x65d   : > { %v1962_v42 = vadd.f32 %v2534_v22, %v1948_v6  ;;  %2686 = vmatprep.subr.bf16.mxu0 %v2887_v33 }
 0x65e   : > { %2676 = vmatprep.mubr.bf16.mxu1 %v1965_v29 }
 0x65f   : > { %v1966_v48 = vpack.c.bf16 %v1962_v42, %v1961_v58  ;;  %2713 = vmatpush3.bf16.msra.mxu1 %v2885_v38 }
 0x660   : > { %2706 = vmatprep.subr.bf16.mxu1 %v2886_v7  ;;  %2687 = vmatpush3.bf16.msra.mxu0 %v2887_v33 }
 0x661   : > { %2688 = vmatprep.subr.bf16.mxu0 %v2888_v26 }
 0x662   : > { %2677 = vmatmul.mubr.bf16.gmra.mrb[12].mxu1 %v1966_v48 }
 0x663   : > { %2714 = vmatpush3.bf16.msra.mxu1 %v2886_v7 }
 0x664   : > { %2707 = vmatprep.subr.bf16.mxu1 %v2887_v33  ;;  %2689 = vmatpush3.bf16.msra.mxu0 %v2888_v26 }
 0x665   : > { %2690 = vmatprep.subr.bf16.mxu0 %v2889_v18 }
 0x667   : > { %2715 = vmatpush3.bf16.msra.mxu1 %v2887_v33 }
 0x668   : > { %2708 = vmatprep.subr.bf16.mxu1 %v2888_v26  ;;  %2691 = vmatpush3.bf16.msra.mxu0 %v2889_v18 }
 0x669   : > { %2692 = vmatprep.subr.bf16.mxu0 %v2890_v60 }
 0x66b   : > { %2716 = vmatpush3.bf16.msra.mxu1 %v2888_v26 }
 0x66c   : > { %2709 = vmatprep.subr.bf16.mxu1 %v2889_v18  ;;  %2693 = vmatpush3.bf16.msra.mxu0 %v2890_v60 }
 0x66d   : > { %2694 = vmatprep.subr.bf16.mxu0 %v2891_v9 }
 0x66f   : > { %2717 = vmatpush3.bf16.msra.mxu1 %v2889_v18 }
 0x670   : > { %2710 = vmatprep.subr.bf16.mxu1 %v2890_v60  ;;  %2695 = vmatpush3.bf16.msra.mxu0 %v2891_v9 }
 0x673   : > { %2718 = vmatpush3.bf16.msra.mxu1 %v2890_v60 }
 0x674   : > { %2711 = vmatprep.subr.bf16.mxu1 %v2891_v9 }
 0x677   : > { %2719 = vmatpush3.bf16.msra.mxu1 %v2891_v9 }
 0x72d   : > { %v2674_v59 = vpop.f32.mrb[8].mxu1 }
 0x72e   : > { %v4146_v16 = vadd.f32 %v2674_v59, %v2535_v13  ;;  %v2072_v8 = vpop.f32.mrb[9].mxu1 }
 0x72f   : > { %v4148_v43 = vadd.f32 %v2535_v13, %v2072_v8  ;;  %v2675_v12 = vpop.f32.mrb[10].mxu1 }
 0x730   : > { %v2113_v57 = vmul.f32 0.044715, %v4146_v16  ;;  %v2084_v32 = vadd.f32 %v2675_v12, %v2535_v13  ;;  %v2075_v31 = vpop.f32.mrb[11].mxu1 }
 0x731   : > { %v2111_v25 = vmul.f32 0.044715, %v4148_v43  ;;  %v4152_v4 = vadd.f32 %v2535_v13, %v2075_v31  ;;  %v2105_v31 = vmul.f32 0.5, %v4146_v16 }
 0x732   : > { %v2121_v27 = vmul.f32 %v2113_v57, %v4146_v16  ;;  %v2114_v30 = vmul.f32 0.044715, %v2084_v32 }
 0x733   : > { %v2119_v37 = vmul.f32 %v2111_v25, %v4148_v43  ;;  %v2112_v56 = vmul.f32 0.044715, %v4152_v4  ;;  %v2106_v25 = vmul.f32 0.5, %v2084_v32 }
 0x734   : > { %v2129_v34 = vmul.f32 %v2121_v27, %v4146_v16  ;;  %v2122_v49 = vmul.f32 %v2114_v30, %v2084_v32 }
 0x735   : > { %v2127_v22 = vmul.f32 %v2119_v37, %v4148_v43  ;;  %v2120_v11 = vmul.f32 %v2112_v56, %v4152_v4  ;;  %v2678_v41 = vpop.f32.mrb[12].mxu1  ;;  %v2103_v37 = vmul.f32 0.5, %v4148_v43 }
 0x736   : > { %v2137_v53 = vadd.f32 %v2129_v34, %v4146_v16  ;;  %v2130_v62 = vmul.f32 %v2122_v49, %v2084_v32  ;;  %v4161_v61 = vadd.f32 %v2678_v41, %v2535_v13  ;;  %v2088_v5 = vpop.f32.mrb[13].mxu1  ;;  %v2104_v34 = vmul.f32 0.5, %v4152_v4 }
 0x737   : > { %v2128_v0 = vmul.f32 %v2120_v11, %v4152_v4  ;;  %v4164_v44 = vadd.f32 %v2535_v13, %v2088_v5  ;;  %v2679_v14 = vpop.f32.mrb[14].mxu1  ;;  %v2135_v54 = vadd.f32 %v2127_v22, %v4148_v43 }
 0x738   : > { %v2145_v47 = vmul.f32 0.7978846, %v2137_v53  ;;  %v2138_v19 = vadd.f32 %v2130_v62, %v2084_v32  ;;  %v2117_v1 = vmul.f32 0.044715, %v4161_v61  ;;  %v2091_v21 = vpop.f32.mrb[15].mxu1  ;;  %v2100_v23 = vadd.f32 %v2679_v14, %v2535_v13 }
 0x739   : > { %v2115_v39 = vmul.f32 0.044715, %v4164_v44  ;;  %v2092_v24 = vadd.f32 %v2535_v13, %v2091_v21  ;;  %v2136_v10 = vadd.f32 %v2128_v0, %v4152_v4  ;;  %v2143_v50 = vmul.f32 0.7978846, %v2135_v54 }
 0x73a   : > { %2942 = vtanh.f32 %v2145_v47  ;;  %v2146_v51 = vmul.f32 0.7978846, %v2138_v19  ;;  %v2125_v28 = vmul.f32 %v2117_v1, %v4161_v61  ;;  %v2118_v15 = vmul.f32 0.044715, %v2100_v23 }
 0x73b   : > { %v2123_v2 = vmul.f32 %v2115_v39, %v4164_v44  ;;  %v2116_v35 = vmul.f32 0.044715, %v2092_v24  ;;  %v2144_v6 = vmul.f32 0.7978846, %v2136_v10  ;;  %v2109_v19 = vmul.f32 0.5, %v4161_v61 }
 0x73c   : > { %2944 = vtanh.f32 %v2146_v51  ;;  %v2133_v52 = vmul.f32 %v2125_v28, %v4161_v61  ;;  %v2126_v58 = vmul.f32 %v2118_v15, %v2100_v23  ;;  %v2110_v43 = vmul.f32 0.5, %v2100_v23 }
 0x73d   : > { %v2131_v29 = vmul.f32 %v2123_v2, %v4164_v44  ;;  %v2124_v42 = vmul.f32 %v2116_v35, %v2092_v24  ;;  %2946 = vtanh.f32 %v2143_v50  ;;  %v2107_v4 = vmul.f32 0.5, %v4164_v44 }
 0x73e   : > { %v2141_v48 = vadd.f32 %v2133_v52, %v4161_v61  ;;  %2948 = vtanh.f32 %v2144_v6  ;;  %v2134_v45 = vmul.f32 %v2126_v58, %v2100_v23  ;;  %v2108_v21 = vmul.f32 0.5, %v2092_v24  ;;  %v2544_v61 = vld [vmem:[%s4307_s15] ss:$0 sm:$0xff] }
 0x73f   : > { %v2132_v38 = vmul.f32 %v2124_v42, %v2092_v24  ;;  %v2139_v7 = vadd.f32 %v2131_v29, %v4164_v44 }
 0x740   : > { %v2149_v33 = vmul.f32 0.7978846, %v2141_v48  ;;  %v2142_v26 = vadd.f32 %v2134_v45, %v2100_v23 }
 0x741   : > { %v2140_v18 = vadd.f32 %v2132_v38, %v2092_v24  ;;  %v2147_v60 = vmul.f32 0.7978846, %v2139_v7 }
 0x742   : > { %2950 = vtanh.f32 %v2149_v33  ;;  %v2150_v9 = vmul.f32 0.7978846, %v2142_v26 }
 0x743   : > { %v2148_v13 = vmul.f32 0.7978846, %v2140_v18  ;;  %2952 = vtanh.f32 %v2147_v60 }
 0x744   : > { %v2943_v59 = vpop.eup %2942  ;;  %2954 = vtanh.f32 %v2150_v9 }
 0x745   : > { %v2161_v8 = vadd.f32 1.0, %v2943_v59  ;;  %2956 = vtanh.f32 %v2148_v13 }
 0x746   : > { %v2945_v12 = vpop.eup %2944 }
 0x747   : > { %v2947_v57 = vpop.eup %2946  ;;  %v2162_v27 = vadd.f32 1.0, %v2945_v12  ;;  %v2169_v22 = vmul.f32 %v2161_v8, %v2105_v31 }
 0x748   : > { %v2949_v30 = vpop.eup %2948  ;;  %v2159_v56 = vadd.f32 1.0, %v2947_v57 }
 0x749   : > { %v2160_v49 = vadd.f32 1.0, %v2949_v30  ;;  %v2170_v11 = vmul.f32 %v2162_v27, %v2106_v25 }
 0x74a   : > { %v2167_v41 = vmul.f32 %v2159_v56, %v2103_v37 }
 0x74b   : > { %v2168_v53 = vmul.f32 %v2160_v49, %v2104_v34  ;;  %v2176_v62 = vpack.c.bf16 %v2170_v11, %v2169_v22 }
 0x74c   : > { %v2951_v5 = vpop.eup %2950 }
 0x74d   : > { %v2953_v0 = vpop.eup %2952  ;;  %v2175_v14 = vpack.c.bf16 %v2168_v53, %v2167_v41  ;;  %v2165_v54 = vadd.f32 1.0, %v2951_v5 }
 0x74e   : > { %v2955_v47 = vpop.eup %2954  ;;  %v2163_v16 = vadd.f32 1.0, %v2953_v0 }
 0x74f   : > { %2696 = vmatprep.mubr.bf16.mxu0 %v2175_v14  ;;  %v2957_v32 = vpop.eup %2956  ;;  %v2166_v1 = vadd.f32 1.0, %v2955_v47  ;;  %v2173_v10 = vmul.f32 %v2165_v54, %v2109_v19 }
 0x750   : > { %2697 = vmatmul.mubr.bf16.vlgmr.msra.gmra.mrb[24].mxu0 %v2176_v62  ;;  %v2164_v39 = vadd.f32 1.0, %v2957_v32  ;;  %v2171_v28 = vmul.f32 %v2163_v16, %v2107_v4 }
 0x751   : > { %v2174_v51 = vmul.f32 %v2166_v1, %v2110_v43 }
 0x752   : > { %v2172_v50 = vmul.f32 %v2164_v39, %v2108_v21 }
 0x753   : > { %v2178_v2 = vpack.c.bf16 %v2174_v51, %v2173_v10 }
 0x754   : > { %v2177_v15 = vpack.c.bf16 %v2172_v50, %v2171_v28 }
 0x756   : > { %2700 = vmatprep.mubr.bf16.mxu1 %v2177_v15 }
 0x757   : > { %2701 = vmatmul.mubr.bf16.vlgmr.msra.gmra.mrb[16].mxu1 %v2178_v2 }
 0x823   : > { %v2698_v23 = vpop.f32.mrb[24].mxu0 }
 0x824   : > { %v2293_v35 = vadd.f32 %v2698_v23, %v2544_v61  ;;  %v2284_v52 = vpop.f32.mrb[25].mxu0 }
 0x825   : > { %v2285_v6 = vadd.f32 %v2544_v61, %v2284_v52  ;;  %v2699_v44 = vpop.f32.mrb[26].mxu0 }
 0x826   : > { %v2317_v24 = vadd.f32 %v2293_v35, %v4025_v40  ;;  %v2296_v29 = vadd.f32 %v2699_v44, %v2544_v61  ;;  %v2287_v58 = vpop.f32.mrb[27].mxu0 }
 0x827   : > { %v2315_v42 = vadd.f32 %v2285_v6, %v4018_v3  ;;  %v2288_v48 = vadd.f32 %v2544_v61, %v2287_v58 }
 0x828   : > { %2325 = vst [vmem:[%s666_s17 + $0x10] sm:$0xff] %v2317_v24  ;;  %v2318_v45 = vadd.f32 %v2296_v29, %v4030_v55 }
 0x829   : > { %2323 = vst [vmem:[%s666_s17] sm:$0xff] %v2315_v42  ;;  %v2316_v38 = vadd.f32 %v2288_v48, %v4021_v63 }
 0x82a   : > { %2326 = vst [vmem:[%s666_s17 + $0x18] sm:$0xff] %v2318_v45  ;;  %v2702_v7 = vpop.f32.mrb[16].mxu1 }
 0x82b   : > { %2324 = vst [vmem:[%s666_s17 + $0x8] sm:$0xff] %v2316_v38  ;;  %v2309_v33 = vadd.f32 %v2702_v7, %v2544_v61  ;;  %v2300_v40 = vpop.f32.mrb[17].mxu1 }
 0x82c   : > { %v2301_v26 = vadd.f32 %v2544_v61, %v2300_v40  ;;  %v2703_v18 = vpop.f32.mrb[18].mxu1 }
 0x82d   : > { %v2321_v3 = vadd.f32 %v2309_v33, %v4038_v17  ;;  %v2312_v60 = vadd.f32 %v2703_v18, %v2544_v61  ;;  %v2303_v9 = vpop.f32.mrb[19].mxu1 }
 0x82e   : > { %v2319_v63 = vadd.f32 %v2301_v26, %v4033_v36  ;;  %v2304_v55 = vadd.f32 %v2544_v61, %v2303_v9 }
 0x82f   : > { %2329 = vst [vmem:[%s666_s17 + $0x30] sm:$0xff] %v2321_v3  ;;  %v2322_v13 = vadd.f32 %v2312_v60, %v4046_v20 }
 0x830   : > { %2327 = vst [vmem:[%s666_s17 + $0x20] sm:$0xff] %v2319_v63  ;;  %v2320_v17 = vadd.f32 %v2304_v55, %v4041_v46 }
 0x831   : > { %2330 = vst [vmem:[%s666_s17 + $0x38] sm:$0xff] %v2322_v13 }
 0x832   : > { %2328 = vst [vmem:[%s666_s17 + $0x28] sm:$0xff] %v2320_v17 }
 0x833   : > { %3149 = shalt.err (!%p3146_p8)
}
 0x834   : > { %s3150_s15 = scalar_lea.hbm %s4199_s1, 1024  ;;  %s3154_s9 = scalar_lea.hbm %s4308_s2, 2048 }
 0x835   : > { %p3151_p6 = scmp.ne.s32.totalorder %s4199_s1, %s3150_s15  ;;  %p3155_p3 = scmp.lt.u32.totalorder %s4199_s1, %s4308_s2 }
 0x836   : > { %p3156_p0 = scmp.lt.u32.totalorder %s3154_s9, %s3150_s15  ;;  %p3158_p2 = scmp.lt.u32.totalorder %s3150_s15, %s4199_s1 }
 0x837   : > { %p3152_p9 = pnand %p3151_p6, %p4309_p7 }
 0x838   : > { %p3157_p5 = por %p3156_p0, %p3155_p3 }
 0x839   : > { %p3153_p4 = pneg %p3152_p9 }
 0x83a   : > { %p3159_p10 = por %p3158_p2, %p3157_p5 }
 0x83c   : > { %p3160_p1 = pnand %p3159_p10, %p3153_p4 }
 0x83e   : > { %3163 = shalt.err (!%p3160_p1)
}
 0x83f   : > { %s3230_s3 = smov 128   ;;  %s3231_s19 = smov 8  }
 0x840   : > { %2742 = dma.vmem_to_hbm [thread:$0]  (%p4309_p7), %s4192_s0, 1024, %s4199_s1, %s2332_s24, %s3230_s3, %s3230_s3, %s3231_s19  }
 0x841 PF: > { %s2360_s25 = sand.u32 1, %s3202_s27   ;;  %p4310_p11 = scmp.ne.s32.totalorder %s4288_s22, 0 }
 0x842   : > { %p4311_p12 = scmp.ge.s32.totalorder %s3214_s30, 2  ;;  %s2361_s15 = scalar_lea.sflag [#allocation5], %s2360_s25 }
 0x844   : > { %p2765_p13 = pnand %p4311_p12, %p4310_p11 }
 0x846   : > { %3197 = dma.done.wait (!%p2765_p13), %s2361_s15, 1024  }
 0x847   : > { %3199 = vsyncadd (!%p2765_p13), %s2361_s15, 4294966272  ;;  %p34_p8 = scmp.ge.s32.totalorder %s3496_s21, 4   ;;  %s4312_s27 = smov %s3206_s28 }
 0x848   : > { %s4313_s28 = smov %s3210_s29  ;;  %s4314_s29 = smov %s3508_s18 }
 0x849   : > { %s4315_s30 = smov %s3496_s21  ;;  %36 = sbr.rel (!%p34_p8) target bundleno = 20 (0x14), region = 159 }
 0x850   :  { %2366 = vsyncpa [#allocation4], 1 }
 0x851   :  { %2368 = vsyncpa [#allocation4 + $0x1], 1 }
 0x852   :  { %2369 = vsyncpa [#allocation7], 1 }
 0x853   :  { %2370 = vsyncpa [#allocation10], 1 }
 0x854   :  { %2371 = vsyncpa [#allocation13], 1 }
 0x855   :  { %2372 = vsyncpa [#allocation5], 1 }
 0x856   :  { %2374 = vsyncpa [#allocation5 + $0x1], 1 }

</bundles_post_ra>
